<compile_context>
chip_gen: v5e
topology: v5e:2x2
jax: 0.10.0
libtpu: 0.0.40
codegen_flags: <defaults>
</compile_context>

<pallas_src>
import functools

import jax
import jax.numpy as jnp
from jax.experimental import pallas as pl
from jax.experimental.pallas import tpu as pltpu

_SUBLANES = 8  # minimum sublane tile for f32/bf16 activations


# ----------------------------------------------------------------------------
# Kernel: one vocab tile per grid step.  Full contraction (tk == D) per step.
#   x_ref: (8, D)  bf16   (VMEM-resident across the whole grid)
#   w_ref: (D, tv) bf16   (streamed from HBM exactly once)
#   b_ref: (1, tv) f32
#   o_ref: (8, tv) f32
# ----------------------------------------------------------------------------
def _lm_head_kernel(x_ref, w_ref, b_ref, o_ref):
    o_ref[...] = (
        jnp.dot(x_ref[...], w_ref[...], preferred_element_type=jnp.float32)
        + b_ref[...]
    )


def _default_vmem_limit_bytes() -> int:
    """Scoped-VMEM limit derived from the chip's physical VMEM capacity."""
    cap = None
    try:
        cap = pltpu.get_tpu_info().vmem_capacity_bytes
    except Exception:  # pragma: no cover - conservative fallback off-TPU/old jax
        cap = None
    if not cap:
        cap = 64 * 1024 * 1024  # conservative (v7x per-TC capacity)
    # Leave headroom for compiler-internal scratch; cap at ~112 MiB.
    return int(min(cap * 3 // 4, 112 * 1024 * 1024))


def _pick_tv(vocab: int, hidden: int, m: int, vmem_limit_bytes: int) -> int:
    """Largest vocab tile (multiple of 128, divisor of V) whose double-buffered
    working set fits the VMEM budget, preferring multiples of 256 and
    keeping >= 4 vocab tiles so v7x's two TensorCores both get work."""
    assert vocab % 128 == 0 and hidden % 128 == 0, (vocab, hidden)
    budget = int(vmem_limit_bytes * 0.8)  # headroom for internal scratch

    def fits(tv: int) -> bool:
        wbytes = 2 * hidden * tv * 2      # double-buffered bf16 weight tiles
        obytes = 2 * m * tv * 4           # double-buffered f32 output tiles
        bbytes = 2 * tv * 4               # double-buffered f32 bias tiles
        xbytes = 2 * m * hidden * 2       # resident bf16 activation (x2 safe)
        return wbytes + obytes + bbytes + xbytes <= budget

    cands = [t for t in range(128, vocab + 1, 128) if vocab % t == 0]
    ok = [t for t in cands if fits(t)]
    assert ok, "hidden dimension too large for VMEM budget; add K-tiling"
    # Prefer >= 4 tiles (megacore + pipelining) and 256-aligned MXU passes.
    pref = [t for t in ok if vocab // t >= 4 and t % 256 == 0]
    if not pref:
        pref = [t for t in ok if vocab // t >= 2]
    if not pref:
        pref = ok
    return max(pref)


@functools.partial(jax.jit, static_argnames=("tv", "vmem_limit"))
def lm_head_pallas(x, w, b2d, *, tv, vmem_limit):
    """logits = x @ w + b on the MXU (bf16 inputs, f32 accumulate).

    x:   (8, D)  bfloat16  (last-token activation, broadcast to 8 sublanes)
    w:   (D, V)  bfloat16
    b2d: (1, V)  float32
    returns (8, V) float32
    """
    M, D = x.shape
    _, V = w.shape
    assert M == _SUBLANES
    assert V % tv == 0

    # Weight streaming dominates; activation is fetched once (constant block
    # index), bias once per tile, output written once.
    bytes_accessed = (
        x.size * x.dtype.itemsize
        + w.size * w.dtype.itemsize
        + b2d.size * b2d.dtype.itemsize
        + M * V * 4
    )
    cost = pl.CostEstimate(
        flops=2 * M * D * V, transcendentals=0, bytes_accessed=bytes_accessed
    )

    grid_spec = pltpu.PrefetchScalarGridSpec(
        num_scalar_prefetch=0,
        grid=(V // tv,),
        in_specs=[
            # Activation: same block index every step -> DMA'd once, resident.
            pl.BlockSpec((M, D), lambda j: (0, 0)),
            # Weights: one full-D column block per step, streamed exactly once.
            pl.BlockSpec((D, tv), lambda j: (0, j)),
            # Bias tile.
            pl.BlockSpec((1, tv), lambda j: (0, j)),
        ],
        out_specs=pl.BlockSpec((M, tv), lambda j: (0, j)),
    )
    return pl.pallas_call(
        _lm_head_kernel,
        out_shape=jax.ShapeDtypeStruct((M, V), jnp.float32),
        grid_spec=grid_spec,
        compiler_params=pltpu.CompilerParams(
            # Independent vocab tiles: shardable across v7x's 2 TensorCores.
            dimension_semantics=("parallel",),
            vmem_limit_bytes=vmem_limit,
        ),
        cost_estimate=cost,
    )(x, w, b2d)


class NeuronHFAdapterWrapPallas:
    """JAX/Pallas port of NeuronHFAdapterWrap (forward only)."""

    def __init__(self, vocab_size: int, hidden: int, seed: int = 0):
        self.vocab_size = vocab_size
        self.hidden = hidden
        k0, k1, k2 = jax.random.split(jax.random.PRNGKey(seed), 3)
        # Deterministic synthetic adapter parameters; weights kept in bf16 so
        # the memory-bound LM-head streams half the bytes.
        # TODO(synk): on v7x an fp8 weight path (with per-column f32 scales)
        # would halve weight traffic again; kept bf16 here for portability.
        self.emb = (
            jax.random.normal(k0, (vocab_size, hidden), jnp.float32) * 0.02
        ).astype(jnp.bfloat16)
        self.w_head = (
            jax.random.normal(k1, (hidden, vocab_size), jnp.float32) * 0.02
        ).astype(jnp.bfloat16)
        self.b_head = jax.random.normal(k2, (1, vocab_size), jnp.float32) * 0.01
        self.cache_ids = None
        self._next_pos = 0
        # Per-generation sizing: full-D contraction, vocab tile as large as the
        # (chip-derived) VMEM budget allows while keeping >= 4 vocab tiles.
        self._vmem_limit = _default_vmem_limit_bytes()
        self._tv = _pick_tv(vocab_size, hidden, _SUBLANES, self._vmem_limit)

    @staticmethod
    def _build_pos(start: int, length: int, batch: int = 1):
        row = (jnp.arange(length, dtype=jnp.int32) + jnp.int32(start))[None, :]
        return jnp.tile(row, (batch, 1))

    def _adapter_last_logits(self, input_ids):
        """Synthetic adapter, restricted to the row the wrapper consumes.

        The wrapper returns logits[0, -1, :], so we gather only the last token
        of batch element 0, broadcast it to the 8-sublane tile, and run the
        Pallas LM-head (weight-streaming GEMV) over the vocab.
        """
        x_last = self.emb[input_ids[0, -1]]                       # (D,) glue gather
        x8 = jnp.broadcast_to(x_last[None, :], (_SUBLANES, self.hidden))
        logits8 = lm_head_pallas(
            x8, self.w_head, self.b_head, tv=self._tv, vmem_limit=self._vmem_limit
        )                                                         # (8, V) hot path
        return logits8[0]                                         # (V,)

    def forward(self, input_ids, cache_ids=None):
        B, L = input_ids.shape
        if cache_ids is None:
            if self._next_pos == 0:
                pos_tensor = None
                next_pos_after = L
            else:
                pos_tensor = self._build_pos(self._next_pos, L, B)
                next_pos_after = self._next_pos + L
        else:
            pos_tensor = cache_ids
            # Matches the reference `int(cache_ids.max().item()) + 1`: keeps
            # _next_pos a Python int so the prefill fast-path stays well-defined.
            next_pos_after = int(jax.device_get(jnp.max(cache_ids))) + 1

        if (
            pos_tensor is not None
            and pos_tensor.ndim == 2
            and pos_tensor.shape[0] == 1
            and pos_tensor.shape[1] == 1
        ):
            pos_tensor = jnp.squeeze(pos_tensor, axis=0)

        # adapter(input_ids=..., cache_ids=pos_tensor, ...) -> last-token logits
        logits = self._adapter_last_logits(input_ids)             # (V,)

        self._next_pos = next_pos_after
        if pos_tensor is None:
            pos_tensor = self._build_pos(0, L, B)
            if (
                pos_tensor.ndim == 2
                and pos_tensor.shape[0] == 1
                and pos_tensor.shape[1] == 1
            ):
                pos_tensor = jnp.squeeze(pos_tensor, axis=0)
        self.cache_ids = jnp.asarray([self._next_pos], dtype=jnp.int32)
        return logits, pos_tensor


if __name__ == "__main__":
    B, L, D, V = 2, 8, 1024, 2048
    key = jax.random.PRNGKey(0)
    input_ids = jax.random.randint(key, (B, L), 0, V, dtype=jnp.int32)

    model = NeuronHFAdapterWrapPallas(vocab_size=V, hidden=D, seed=0)

    # ---- prefill call: cache_ids=None, _next_pos == 0 ----
    logits, pos = model.forward(input_ids)
    jax.block_until_ready(logits)
    jax.block_until_ready(pos)

    w_f32 = model.w_head.astype(jnp.float32)
    x_ref = model.emb[input_ids[0, -1]].astype(jnp.float32)
    ref_logits = x_ref @ w_f32 + model.b_head[0]

    assert logits.shape == (V,) and logits.dtype == jnp.float32
    assert pos.shape == (B, L) and pos.dtype == jnp.int32
    assert bool(
        jnp.all(pos == jnp.tile(jnp.arange(L, dtype=jnp.int32)[None, :], (B, 1)))
    )
    assert jnp.allclose(logits, ref_logits, atol=1e-2, rtol=1e-2)
    assert int(model._next_pos) == L and int(model.cache_ids[0]) == L

    # ---- incremental decode call: one new token, cursor-based positions ----
    new_ids = jax.random.randint(jax.random.PRNGKey(1), (B, 1), 0, V, dtype=jnp.int32)
    logits2, pos2 = model.forward(new_ids)
    jax.block_until_ready(logits2)

    x2_ref = model.emb[new_ids[0, -1]].astype(jnp.float32)
    ref_logits2 = x2_ref @ w_f32 + model.b_head[0]
    assert jnp.allclose(logits2, ref_logits2, atol=1e-2, rtol=1e-2)
    assert pos2.shape == (B, 1) and int(pos2[0, 0]) == L
    assert int(model._next_pos) == L + 1 and int(model.cache_ids[0]) == L + 1

    print("KERNEL_OK")
</pallas_src>

<mosaic_0001>
module attributes {stable_mosaic.version = 11 : i64} {
  func.func @_lm_head_kernel(%arg0: i32, %arg1: memref<8x1024xbf16, #tpu.memory_space<vmem>>, %arg2: memref<1024x512xbf16, #tpu.memory_space<vmem>>, %arg3: memref<1x512xf32, #tpu.memory_space<vmem>>, %arg4: memref<8x512xf32, #tpu.memory_space<vmem>>) attributes {dimension_semantics = [#tpu.dimension_semantics<parallel>], iteration_bounds = array<i64: 4>, scalar_prefetch = 0 : i64, scratch_operands = 0 : i64, tpu.core_type = #tpu.core_type<tc>, window_params = [{pipeline_mode = #tpu.pipeline_mode<synchronous>, transform_indices = @transform_0, window_bounds = array<i64: 8, 1024>}, {transform_indices = @transform_1, window_bounds = array<i64: 1024, 512>}, {transform_indices = @transform_2, window_bounds = array<i64: 1, 512>}, {transform_indices = @transform_3, window_bounds = array<i64: 8, 512>}]} {
    %c0 = arith.constant 0 : index
    %c0_0 = arith.constant 0 : index
    %0 = vector.load %arg1[%c0, %c0_0] : memref<8x1024xbf16, #tpu.memory_space<vmem>>, vector<8x1024xbf16>
    %c0_1 = arith.constant 0 : index
    %c0_2 = arith.constant 0 : index
    %1 = vector.load %arg2[%c0_1, %c0_2] : memref<1024x512xbf16, #tpu.memory_space<vmem>>, vector<1024x512xbf16>
    %cst = arith.constant dense<0.000000e+00> : vector<8x512xf32>
    %2 = tpu.matmul %0, %1, %cst {dimension_numbers = #tpu.dot_dimension_numbers<[1], [0], [0], [1], [0, 0, 1, 1], [], []>} : vector<8x1024xbf16>, vector<1024x512xbf16>, vector<8x512xf32> -> vector<8x512xf32>
    %c0_3 = arith.constant 0 : index
    %c0_4 = arith.constant 0 : index
    %3 = vector.load %arg3[%c0_3, %c0_4] : memref<1x512xf32, #tpu.memory_space<vmem>>, vector<1x512xf32>
    %4 = vector.broadcast %3 : vector<1x512xf32> to vector<8x512xf32>
    %5 = arith.addf %2, %4 : vector<8x512xf32>
    %c0_5 = arith.constant 0 : index
    %c0_6 = arith.constant 0 : index
    %6 = vector.load %arg4[%c0_5, %c0_6] : memref<8x512xf32, #tpu.memory_space<vmem>>, vector<8x512xf32>
    tpu.vector_store %arg4[%c0_5, %c0_6], %5 {strides = array<i32>} : memref<8x512xf32, #tpu.memory_space<vmem>>, vector<8x512xf32>,
    return
  }
  func.func @transform_0(%arg0: i32) -> (i32, i32) {
    %c0_i32 = arith.constant 0 : i32
    %c0_i32_0 = arith.constant 0 : i32
    %c0_i32_1 = arith.constant 0 : i32
    return %c0_i32, %c0_i32_0 : i32, i32
  }
  func.func @transform_1(%arg0: i32) -> (i32, i32) {
    %c0_i32 = arith.constant 0 : i32
    %c0_i32_0 = arith.constant 0 : i32
    return %c0_i32, %arg0 : i32, i32
  }
  func.func @transform_2(%arg0: i32) -> (i32, i32) {
    %c0_i32 = arith.constant 0 : i32
    %c0_i32_0 = arith.constant 0 : i32
    return %c0_i32, %arg0 : i32, i32
  }
  func.func @transform_3(%arg0: i32) -> (i32, i32) {
    %c0_i32 = arith.constant 0 : i32
    %c0_i32_0 = arith.constant 0 : i32
    return %c0_i32, %arg0 : i32, i32
  }
}

</mosaic_0001>

<bundles_post_ra>
// kernel: lm_head_pallas.1
= control target key start
LH: loop header
LB: loop body
LE: loop exit
PB: predicated region body
PF: predicated region fallthrough
CT: control target
= control target key end

     0   :  { %s4676_s0 = inlined_call_operand.hbm [shape: bf16[8,1024], index: 0, kind: input, shape index: {}]   ;;  %s4677_s1 = inlined_call_operand.hbm [shape: bf16[1024,2048], index: 1, kind: input, shape index: {}]   ;;  %s4678_s2 = inlined_call_operand.hbm [shape: f32[1,2048], index: 2, kind: input, shape index: {}]   ;;  %s4679_s3 = inlined_call_operand.hbm [shape: f32[8,2048], index: 3, kind: output, shape index: {}]  }
   0x1   :  { %4680 = sst [smem:[#allocation12_spill]] %s4676_s0 }
   0x2   :  { %8 = vsyncpa [#allocation3], 0 }
   0x3   :  { %9 = vsyncpa [#allocation6], 0 }
   0x4   :  { %11 = vsyncpa [#allocation6 + $0x1], 0 }
   0x5   :  { %12 = vsyncpa [#allocation4], 0 }
   0x6   :  { %14 = vsyncpa [#allocation4 + $0x1], 0  ;;  %s3914_s12 = smov 0   ;;  %s3916_s13 = smov 0  }
   0x7   :  { %s3918_s14 = smov 0   ;;  %s3920_s15 = smov 0  }
   0x8 LB: > { %s3935_s16 = sadd.s32 1, %s3888_s15   ;;  %s48_s17 = sadd.s32 1, %s3884_s14  ;;  %s3888_s15 = sphi %s3920_s15, %s4690_s15   ;;  %s3884_s14 = sphi %s3918_s14, %s4689_s14   ;;  %s3880_s13 = sphi %s3916_s13, %s4688_s13   ;;  %s3876_s12 = sphi %s3914_s12, %s4687_s12  }
   0x9   : > { %s45_s18 = ssub.s32 %s3888_s15, %s3935_s16  ;;  %p55_p0 = scmp.ne.s32.totalorder %s3884_s14, %s3880_s13 }
   0xa   : > { %p46_p1 = scmp.eq.s32.totalorder %s45_s18, 0  ;;  %p56_p2 = scmp.eq.s32.totalorder %s3888_s15, 0 }
   0xb   : > { %p3689_p3 = scmp.lt.s32.totalorder %s3888_s15, 4  ;;  %s149_s20 = sand.u32 1, %s3888_s15  }
   0xc   : > { %s3945_s19 = scalar_select %p46_p1, %s3884_s14, %s48_s17  }
   0xd   : > { %p57_p4 = por %p56_p2, %p55_p0  ;;  %s151_s21 = sand.u32 1, %s3884_s14  }
   0xe   : > { %s2366_s22 = sshll.u32 %s151_s21, 11  ;;  %s3405_s23 = sshll.u32 %s3888_s15, 4 }
   0xf   : > { %s158_s26 = scalar_lea.hbm %s4677_s1, %s3405_s23  ;;  %s153_s28 = scalar_lea.vmem [#allocation5], %s2366_s22 }
  0x10   : > { %s159_s27 = sshll.u32 %s158_s26, 4  ;;  %s161_s29 = sshll.u32 %s153_s28, 4  ;;  %s160_s27 = int_to_ptr.hbm [resolvable:$true] %s159_s27  ;;  %s162_s29 = int_to_ptr.vmem [resolvable:$true] %s161_s29 }
  0x11   : > { %p3960_p5 = pnand %p3689_p3, %p57_p4  ;;  %s3964_s4 = scalar_lea.sflag [#allocation6], %s149_s20 }
  0x12   : > { %s3728_s5 = sshra.s32 %s160_s27, 4  ;;  %s3735_s9 = scalar_lea.hbm %s4677_s1, 8192  ;;  %s3729_s5 = int_to_ptr.hbm [resolvable:$true] %s3728_s5 }
  0x13   : > { %s3730_s6 = scalar_lea.hbm %s3729_s5, 2048  ;;  %p3732_p7 = pneg %p3960_p5 }
  0x14   : > { %p3731_p6 = scmp.ne.s32.totalorder %s3729_s5, %s3730_s6  ;;  %p3736_p10 = scmp.lt.s32.totalorder %s3729_s5, %s4677_s1 }
  0x15   : > { %p3737_p11 = scmp.lt.s32.totalorder %s3735_s9, %s3730_s6 }
  0x16   : > { %p3733_p8 = pnand %p3732_p7, %p3731_p6 }
  0x17   : > { %p3738_p12 = por %p3737_p11, %p3736_p10 }
  0x18   : > { %p3734_p9 = pneg %p3733_p8 }
  0x1a   : > { %p3739_p13 = pnand %p3738_p12, %p3734_p9 }
  0x1c   : > { %3742 = shalt.err (!%p3739_p13)
}
  0x1d   : > { %s3890_s17 = smov 1024   ;;  %s3891_s18 = smov 256  }
  0x1e   : > { %s3892_s20 = smov 16   ;;  %s3981_s22 = sadd.s32 4294967295, %s3888_s15  }
  0x1f   : > { %3680 = dma.hbm_to_vmem [thread:$0]  (!%p3960_p5), %s160_s27, 32768, %s162_s29, %s3964_s4, %s3890_s17, %s3891_s18, %s3892_s20  }
  0x20   : > { %s2362_s23 = sadd.s32 4294967294, %s3888_s15   ;;  %p61_p1 = scmp.ne.s32.totalorder %s3880_s13, %s3876_s12 }
  0x21   : > { %p62_p2 = scmp.eq.s32.totalorder %s3981_s22, 0  ;;  %p111_p3 = scmp.eq.s32.totalorder %s3981_s22, 3 }
  0x22   : > { %p117_p4 = scmp.eq.s32.totalorder %s2362_s23, 3  ;;  %p2363_p6 = scmp.ge.s32.totalorder %s3888_s15, 1 }
  0x23   : > { %p3991_p8 = por %p62_p2, %p61_p1  ;;  %p3998_p9 = por %p111_p3, %p55_p0 }
  0x24   : > { %p4002_p10 = por %p117_p4, %p61_p1  ;;  %p124_p11 = scmp.lt.s32.totalorder %s3888_s15, 5 }
  0x25   : > { %s4685_s0 = sld [smem:[#allocation12_spill]]  ;;  %s2369_s6 = sshll.u32 %s151_s21, 2 }
  0x26   : > { %p4010_p12 = pnand %p2363_p6, %p124_p11  ;;  %s3893_s7 = smov [#allocation2]  }
  0x27   : > { %s138_s8 = sshll.u32 %s3893_s7, 4  ;;  %s2370_s9 = sshll.u32 %s3888_s15, 2  ;;  %s139_s8 = int_to_ptr.vmem [resolvable:$true] %s138_s8 }
  0x28   : > { %p3673_p0 = pneg %p4010_p12  ;;  %s179_s17 = scalar_lea.hbm %s4678_s2, %s2370_s9 }
  0x29   : > { %s175_s18 = scalar_lea.vmem [#allocation7], %s2369_s6  ;;  %s181_s23 = sshll.u32 %s179_s17, 4  ;;  %s182_s23 = int_to_ptr.hbm [resolvable:$true] %s181_s23 }
  0x2a   : > { %p3674_p13 = pnand %p3673_p0, %p62_p2  ;;  %s183_s20 = sshll.u32 %s175_s18, 4  ;;  %s184_s20 = int_to_ptr.vmem [resolvable:$true] %s183_s20 }
  0x2b   : > { %s136_s29 = sshll.u32 %s4685_s0, 4  ;;  %s3788_s21 = sshra.s32 %s182_s23, 4  ;;  %s137_s29 = int_to_ptr.hbm [resolvable:$true] %s136_s29  ;;  %s3789_s21 = int_to_ptr.hbm [resolvable:$true] %s3788_s21 }
  0x2c   : > { %3676 = dma.hbm_to_vmem [thread:$0]  (!%p3674_p13), %s137_s29, 512, %s139_s8, [#allocation3]  }
  0x2d   : > { %s3790_s27 = scalar_lea.hbm %s3789_s21, 4  ;;  %s3795_s0 = scalar_lea.hbm %s4678_s2, 16 }
  0x2e   : > { %p3791_p1 = scmp.ne.s32.totalorder %s3789_s21, %s3790_s27  ;;  %p3796_p6 = scmp.lt.s32.totalorder %s3789_s21, %s4678_s2 }
  0x2f   : > { %p3797_p11 = scmp.lt.s32.totalorder %s3795_s0, %s3790_s27 }
  0x30   : > { %p3793_p3 = pnand %p3791_p1, %p3732_p7 }
  0x31   : > { %p3798_p0 = por %p3797_p11, %p3796_p6 }
  0x32   : > { %p3794_p4 = pneg %p3793_p3 }
  0x34   : > { %p3799_p13 = pnand %p3798_p0, %p3794_p4 }
  0x36   : > { %3802 = shalt.err (!%p3799_p13)
}
  0x37   : > { %3683 = dma.hbm_to_vmem [thread:$0]  (!%p3960_p5), %s182_s23, 64, %s184_s20, %s3964_s4  }
  0x38   : > { %192 = sbr.rel (%p4010_p12) target bundleno = 468 (0x1d4), region = 32 }
  0x3d   : > { %3863 = dma.done.wait (%p62_p2), [#allocation3], 512  }
  0x3e   : > { %3865 = vsyncadd (%p62_p2), [#allocation3], 4294966784  ;;  %s199_s0 = sand.u32 1, %s3981_s22   ;;  %s4044_s29 = sand.u32 1, %s3880_s13  }
  0x3f   : > { %s2373_s6 = sshll.u32 %s4044_s29, 11  ;;  %s200_s30 = scalar_lea.sflag [#allocation6], %s199_s0 }
  0x40   : > { %s4047_s8 = scalar_lea.vmem [#allocation5], %s2373_s6 }
  0x41   : > { %3867 = dma.done.wait (%p3991_p8), %s200_s30, 32832  }
  0x42   : > { %3869 = vsyncadd (%p3991_p8), %s200_s30, 4294934464  ;;  %v2490_v0 = vld [vmem:[%s4047_s8 + $0xe0] sm:$0xf]  ;;  %v3436_v1 = vld [vmem:[%s4047_s8 + $0xec] sm:$0xf0]  ;;  %s2374_s4 = sshll.u32 %s4044_s29, 2 }
  0x43   : > { %v2618_v2 = vld [vmem:[%s4047_s8 + $0x1e0] sm:$0xf]  ;;  %v2491_v3 = vor.u32 %v3436_v1, %v2490_v0  ;;  %v3468_v4 = vld [vmem:[%s4047_s8 + $0x1ec] sm:$0xf0]  ;;  %s213_s24 = scalar_lea.vmem [#allocation7], %s2374_s4  ;;  %s2375_s5 = sshll.u32 %s4044_s29, 5 }
  0x44   : > { %v2746_v5 = vld [vmem:[%s4047_s8 + $0x2e0] sm:$0xf]  ;;  %v3500_v6 = vld [vmem:[%s4047_s8 + $0x2ec] sm:$0xf0]  ;;  %v2619_v7 = vor.u32 %v3468_v4, %v2618_v2  ;;  %s4543_s11 = scalar_lea.vmem [#allocation8], %s2375_s5  ;;  %s3662_s17 = sshll.u32 %s3981_s22, 5 }
  0x45   : > { %v2747_v8 = vor.u32 %v3500_v6, %v2746_v5  ;;  %v2874_v9 = vld [vmem:[%s4047_s8 + $0x3e0] sm:$0xf]  ;;  %v3532_v10 = vld [vmem:[%s4047_s8 + $0x3ec] sm:$0xf0]  ;;  %1823 = vmatpush.bf16.msra.mxu0 %v2491_v3  ;;  %s2255_s23 = scalar_lea.hbm %s4679_s3, %s3662_s17  ;;  %s2257_s21 = sshll.u32 %s4543_s11, 4  ;;  %s2258_s21 = int_to_ptr.vmem [resolvable:$true] %s2257_s21 }
  0x46   : > { %v2474_v11 = vld [vmem:[%s4047_s8 + $0xc0] sm:$0xf]  ;;  %v2875_v12 = vor.u32 %v3532_v10, %v2874_v9  ;;  %v3432_v13 = vld [vmem:[%s4047_s8 + $0xcc] sm:$0xf0]  ;;  %1836 = vmatpush.bf16.msra.mxu1 %v2619_v7  ;;  %s2259_s27 = sshll.u32 %s2255_s23, 4  ;;  %s2244_s28 = scalar_lea.sflag [#allocation4], %s4044_s29  ;;  %s2260_s27 = int_to_ptr.hbm [resolvable:$true] %s2259_s27 }
  0x47   : > { %v2602_v14 = vld [vmem:[%s4047_s8 + $0x1c0] sm:$0xf]  ;;  %v3464_v15 = vld [vmem:[%s4047_s8 + $0x1cc] sm:$0xf0]  ;;  %1849 = vmatpush.bf16.msra.mxu2 %v2747_v8  ;;  %v2475_v16 = vor.u32 %v3432_v13, %v2474_v11  ;;  %s3832_s22 = sshra.s32 %s2260_s27, 4  ;;  %s3838_s0 = scalar_lea.hbm %s4679_s3, 128  ;;  %s3833_s22 = int_to_ptr.hbm [resolvable:$true] %s3832_s22 }
  0x48   : > { %v2603_v17 = vor.u32 %v3464_v15, %v2602_v14  ;;  %v2730_v18 = vld [vmem:[%s4047_s8 + $0x2c0] sm:$0xf]  ;;  %v3496_v19 = vld [vmem:[%s4047_s8 + $0x2cc] sm:$0xf0]  ;;  %1862 = vmatpush.bf16.msra.mxu3 %v2875_v12  ;;  %s3834_s7 = scalar_lea.hbm %s3833_s22, 32  ;;  %p3839_p8 = scmp.lt.s32.totalorder %s3833_s22, %s4679_s3 }
  0x49   : > { %v2858_v20 = vld [vmem:[%s4047_s8 + $0x3c0] sm:$0xf]  ;;  %v2731_v21 = vor.u32 %v3496_v19, %v2730_v18  ;;  %v3528_v22 = vld [vmem:[%s4047_s8 + $0x3cc] sm:$0xf0]  ;;  %1824 = vmatpush.bf16.msra.mxu0 %v2475_v16  ;;  %p3835_p5 = scmp.ne.s32.totalorder %s3833_s22, %s3834_s7  ;;  %p3840_p12 = scmp.lt.s32.totalorder %s3838_s0, %s3834_s7 }
  0x4a   : > { %v2458_v23 = vld [vmem:[%s4047_s8 + $0xa0] sm:$0xf]  ;;  %v3428_v24 = vld [vmem:[%s4047_s8 + $0xac] sm:$0xf0]  ;;  %v2859_v25 = vor.u32 %v3528_v22, %v2858_v20  ;;  %1837 = vmatpush.bf16.msra.mxu1 %v2603_v17 }
  0x4b   : > { %v2586_v26 = vld [vmem:[%s4047_s8 + $0x1a0] sm:$0xf]  ;;  %v3460_v27 = vld [vmem:[%s4047_s8 + $0x1ac] sm:$0xf0]  ;;  %v2459_v29 = vor.u32 %v3428_v24, %v2458_v23  ;;  %1850 = vmatpush.bf16.msra.mxu2 %v2731_v21  ;;  %p3836_p7 = pnand %p3835_p5, %p3998_p9  ;;  %p3841_p1 = por %p3840_p12, %p3839_p8 }
  0x4c   : > { %v2714_v28 = vld [vmem:[%s4047_s8 + $0x2a0] sm:$0xf]  ;;  %v3492_v30 = vld [vmem:[%s4047_s8 + $0x2ac] sm:$0xf0]  ;;  %v2587_v33 = vor.u32 %v3460_v27, %v2586_v26  ;;  %1863 = vmatpush.bf16.msra.mxu3 %v2859_v25 }
  0x4d   : > { %v2842_v31 = vld [vmem:[%s4047_s8 + $0x3a0] sm:$0xf]  ;;  %v3524_v32 = vld [vmem:[%s4047_s8 + $0x3ac] sm:$0xf0]  ;;  %v2715_v34 = vor.u32 %v3492_v30, %v2714_v28  ;;  %1825 = vmatpush.bf16.msra.mxu0 %v2459_v29  ;;  %p3837_p2 = pneg %p3836_p7 }
  0x4e   : > { %v2442_v35 = vld [vmem:[%s4047_s8 + $0x80] sm:$0xf]  ;;  %v3424_v36 = vld [vmem:[%s4047_s8 + $0x8c] sm:$0xf0]  ;;  %v2843_v38 = vor.u32 %v3524_v32, %v2842_v31  ;;  %1838 = vmatpush.bf16.msra.mxu1 %v2587_v33 }
  0x4f   : > { %v2570_v37 = vld [vmem:[%s4047_s8 + $0x180] sm:$0xf]  ;;  %v3456_v39 = vld [vmem:[%s4047_s8 + $0x18c] sm:$0xf0]  ;;  %v2443_v44 = vor.u32 %v3424_v36, %v2442_v35  ;;  %1851 = vmatpush.bf16.msra.mxu2 %v2715_v34  ;;  %p3842_p3 = pnand %p3841_p1, %p3837_p2 }
  0x50   : > { %v2698_v40 = vld [vmem:[%s4047_s8 + $0x280] sm:$0xf]  ;;  %v3488_v41 = vld [vmem:[%s4047_s8 + $0x28c] sm:$0xf0]  ;;  %v2571_v45 = vor.u32 %v3456_v39, %v2570_v37  ;;  %1864 = vmatpush.bf16.msra.mxu3 %v2843_v38 }
  0x51   : > { %v2826_v42 = vld [vmem:[%s4047_s8 + $0x380] sm:$0xf]  ;;  %v3520_v43 = vld [vmem:[%s4047_s8 + $0x38c] sm:$0xf0]  ;;  %v2699_v46 = vor.u32 %v3488_v41, %v2698_v40  ;;  %1826 = vmatpush.bf16.msra.mxu0 %v2443_v44 }
  0x52   : > { %v2426_v47 = vld [vmem:[%s4047_s8 + $0x60] sm:$0xf]  ;;  %v3420_v48 = vld [vmem:[%s4047_s8 + $0x6c] sm:$0xf0]  ;;  %v2827_v50 = vor.u32 %v3520_v43, %v2826_v42  ;;  %1839 = vmatpush.bf16.msra.mxu1 %v2571_v45 }
  0x53   : > { %v2554_v49 = vld [vmem:[%s4047_s8 + $0x160] sm:$0xf]  ;;  %v3452_v51 = vld [vmem:[%s4047_s8 + $0x16c] sm:$0xf0]  ;;  %v2427_v56 = vor.u32 %v3420_v48, %v2426_v47  ;;  %1852 = vmatpush.bf16.msra.mxu2 %v2699_v46 }
  0x54   : > { %v2682_v52 = vld [vmem:[%s4047_s8 + $0x260] sm:$0xf]  ;;  %v3484_v53 = vld [vmem:[%s4047_s8 + $0x26c] sm:$0xf0]  ;;  %v2555_v57 = vor.u32 %v3452_v51, %v2554_v49  ;;  %1865 = vmatpush.bf16.msra.mxu3 %v2827_v50 }
  0x55   : > { %v2810_v54 = vld [vmem:[%s4047_s8 + $0x360] sm:$0xf]  ;;  %v3516_v55 = vld [vmem:[%s4047_s8 + $0x36c] sm:$0xf0]  ;;  %v2683_v58 = vor.u32 %v3484_v53, %v2682_v52  ;;  %1827 = vmatpush.bf16.msra.mxu0 %v2427_v56 }
  0x56   : > { %v2410_v59 = vld [vmem:[%s4047_s8 + $0x40] sm:$0xf]  ;;  %v3416_v60 = vld [vmem:[%s4047_s8 + $0x4c] sm:$0xf0]  ;;  %v2811_v62 = vor.u32 %v3516_v55, %v2810_v54  ;;  %1840 = vmatpush.bf16.msra.mxu1 %v2555_v57 }
  0x57   : > { %v2538_v61 = vld [vmem:[%s4047_s8 + $0x140] sm:$0xf]  ;;  %v3448_v63 = vld [vmem:[%s4047_s8 + $0x14c] sm:$0xf0]  ;;  %v2411_v4 = vor.u32 %v3416_v60, %v2410_v59  ;;  %1853 = vmatpush.bf16.msra.mxu2 %v2683_v58  ;;  %v246_v58 = vld [vmem:[#allocation2 + $0x8] sm:$0xff] }
  0x58   : > { %v2666_v0 = vld [vmem:[%s4047_s8 + $0x240] sm:$0xf]  ;;  %v3480_v1 = vld [vmem:[%s4047_s8 + $0x24c] sm:$0xf0]  ;;  %v2539_v5 = vor.u32 %v3448_v63, %v2538_v61  ;;  %1866 = vmatpush.bf16.msra.mxu3 %v2811_v62  ;;  %v521_v63 = vunpack.c.l.b16 %v246_v58 }
  0x59   : > { %v2794_v2 = vld [vmem:[%s4047_s8 + $0x340] sm:$0xf]  ;;  %v3512_v3 = vld [vmem:[%s4047_s8 + $0x34c] sm:$0xf0]  ;;  %v2667_v6 = vor.u32 %v3480_v1, %v2666_v0  ;;  %1828 = vmatpush.bf16.msra.mxu0 %v2411_v4  ;;  %v522_v0 = vunpack.c.h.b16 %v246_v58 }
  0x5a   : > { %v2394_v7 = vld [vmem:[%s4047_s8 + $0x20] sm:$0xf]  ;;  %v3412_v8 = vld [vmem:[%s4047_s8 + $0x2c] sm:$0xf0]  ;;  %v2795_v10 = vor.u32 %v3512_v3, %v2794_v2  ;;  %1841 = vmatpush.bf16.msra.mxu1 %v2539_v5  ;;  %v4141_v4 = vpack.c.b16 %v521_v63, %v521_v63 }
  0x5b   : > { %v2522_v9 = vld [vmem:[%s4047_s8 + $0x120] sm:$0xf]  ;;  %v3444_v11 = vld [vmem:[%s4047_s8 + $0x12c] sm:$0xf0]  ;;  %v2395_v16 = vor.u32 %v3412_v8, %v2394_v7  ;;  %1854 = vmatpush.bf16.msra.mxu2 %v2667_v6  ;;  %v4143_v6 = vpack.c.b16 %v522_v0, %v522_v0 }
  0x5c   : > { %v2650_v12 = vld [vmem:[%s4047_s8 + $0x220] sm:$0xf]  ;;  %v3476_v13 = vld [vmem:[%s4047_s8 + $0x22c] sm:$0xf0]  ;;  %v2523_v19 = vor.u32 %v3444_v11, %v2522_v9  ;;  %1867 = vmatpush.bf16.msra.mxu3 %v2795_v10 }
  0x5d   : > { %v2778_v14 = vld [vmem:[%s4047_s8 + $0x320] sm:$0xf]  ;;  %v3508_v15 = vld [vmem:[%s4047_s8 + $0x32c] sm:$0xf0]  ;;  %v2651_v20 = vor.u32 %v3476_v13, %v2650_v12  ;;  %1829 = vmatpush.bf16.msra.mxu0 %v2395_v16 }
  0x5e   : > { %v2378_v17 = vld [vmem:[%s4047_s8] sm:$0xf]  ;;  %v3408_v18 = vld [vmem:[%s4047_s8 + $0xc] sm:$0xf0]  ;;  %v2779_v24 = vor.u32 %v3508_v15, %v2778_v14  ;;  %1842 = vmatpush.bf16.msra.mxu1 %v2523_v19 }
  0x5f   : > { %v2506_v21 = vld [vmem:[%s4047_s8 + $0x100] sm:$0xf]  ;;  %v3440_v22 = vld [vmem:[%s4047_s8 + $0x10c] sm:$0xf0]  ;;  %v2379_v31 = vor.u32 %v3408_v18, %v2378_v17  ;;  %1855 = vmatpush.bf16.msra.mxu2 %v2651_v20 }
  0x60   : > { %v2634_v23 = vld [vmem:[%s4047_s8 + $0x200] sm:$0xf]  ;;  %v3472_v25 = vld [vmem:[%s4047_s8 + $0x20c] sm:$0xf0]  ;;  %v2507_v35 = vor.u32 %v3440_v22, %v2506_v21  ;;  %1868 = vmatpush.bf16.msra.mxu3 %v2779_v24 }
  0x61   : > { %v2762_v26 = vld [vmem:[%s4047_s8 + $0x300] sm:$0xf]  ;;  %v3504_v27 = vld [vmem:[%s4047_s8 + $0x30c] sm:$0xf0]  ;;  %v2635_v36 = vor.u32 %v3472_v25, %v2634_v23  ;;  %1830 = vmatpush.bf16.msra.mxu0 %v2379_v31 }
  0x62   : > { %v3002_v28 = vld [vmem:[%s4047_s8 + $0x4e0] sm:$0xf]  ;;  %v3564_v29 = vld [vmem:[%s4047_s8 + $0x4ec] sm:$0xf0]  ;;  %v2763_v39 = vor.u32 %v3504_v27, %v2762_v26  ;;  %1843 = vmatpush.bf16.msra.mxu1 %v2507_v35 }
  0x63   : > { %v3130_v30 = vld [vmem:[%s4047_s8 + $0x5e0] sm:$0xf]  ;;  %v3596_v32 = vld [vmem:[%s4047_s8 + $0x5ec] sm:$0xf0]  ;;  %v3003_v40 = vor.u32 %v3564_v29, %v3002_v28  ;;  %1856 = vmatpush.bf16.msra.mxu2 %v2635_v36 }
  0x64   : > { %v3258_v33 = vld [vmem:[%s4047_s8 + $0x6e0] sm:$0xf]  ;;  %v3628_v34 = vld [vmem:[%s4047_s8 + $0x6ec] sm:$0xf0]  ;;  %v3131_v41 = vor.u32 %v3596_v32, %v3130_v30  ;;  %1869 = vmatpush.bf16.msra.mxu3 %v2763_v39 }
  0x65   : > { %v3386_v37 = vld [vmem:[%s4047_s8 + $0x7e0] sm:$0xf]  ;;  %v3660_v38 = vld [vmem:[%s4047_s8 + $0x7ec] sm:$0xf0]  ;;  %v3259_v42 = vor.u32 %v3628_v34, %v3258_v33  ;;  %1875 = vmatpush.bf16.msrb.mxu0 %v3003_v40 }
  0x66   : > { %v2986_v43 = vld [vmem:[%s4047_s8 + $0x4c0] sm:$0xf]  ;;  %v3560_v44 = vld [vmem:[%s4047_s8 + $0x4cc] sm:$0xf0]  ;;  %v3387_v46 = vor.u32 %v3660_v38, %v3386_v37  ;;  %1888 = vmatpush.bf16.msrb.mxu1 %v3131_v41  ;;  %1857 = vmatmul.bf16.vlgmr.msra.gmra.mxu2 %v4141_v4 }
  0x67   : > { %v3114_v45 = vld [vmem:[%s4047_s8 + $0x5c0] sm:$0xf]  ;;  %v3592_v47 = vld [vmem:[%s4047_s8 + $0x5cc] sm:$0xf0]  ;;  %v2987_v52 = vor.u32 %v3560_v44, %v2986_v43  ;;  %1901 = vmatpush.bf16.msrb.mxu2 %v3259_v42  ;;  %1870 = vmatmul.bf16.vlgmr.msra.gmra.mxu3 %v4143_v6 }
  0x68   : > { %v3242_v48 = vld [vmem:[%s4047_s8 + $0x6c0] sm:$0xf]  ;;  %v3624_v49 = vld [vmem:[%s4047_s8 + $0x6cc] sm:$0xf0]  ;;  %v3115_v54 = vor.u32 %v3592_v47, %v3114_v45  ;;  %1914 = vmatpush.bf16.msrb.mxu3 %v3387_v46 }
  0x69   : > { %v3370_v50 = vld [vmem:[%s4047_s8 + $0x7c0] sm:$0xf]  ;;  %v3656_v51 = vld [vmem:[%s4047_s8 + $0x7cc] sm:$0xf0]  ;;  %v3243_v55 = vor.u32 %v3624_v49, %v3242_v48  ;;  %1876 = vmatpush.bf16.msrb.mxu0 %v2987_v52 }
  0x6a   : > { %v2970_v53 = vld [vmem:[%s4047_s8 + $0x4a0] sm:$0xf]  ;;  %v3556_v56 = vld [vmem:[%s4047_s8 + $0x4ac] sm:$0xf0]  ;;  %v3371_v59 = vor.u32 %v3656_v51, %v3370_v50  ;;  %1889 = vmatpush.bf16.msrb.mxu1 %v3115_v54 }
  0x6b   : > { %v3098_v57 = vld [vmem:[%s4047_s8 + $0x5a0] sm:$0xf]  ;;  %v3588_v60 = vld [vmem:[%s4047_s8 + $0x5ac] sm:$0xf0]  ;;  %v2971_v3 = vor.u32 %v3556_v56, %v2970_v53  ;;  %1902 = vmatpush.bf16.msrb.mxu2 %v3243_v55 }
  0x6c   : > { %v3226_v61 = vld [vmem:[%s4047_s8 + $0x6a0] sm:$0xf]  ;;  %v3620_v62 = vld [vmem:[%s4047_s8 + $0x6ac] sm:$0xf0]  ;;  %v3099_v7 = vor.u32 %v3588_v60, %v3098_v57  ;;  %1915 = vmatpush.bf16.msrb.mxu3 %v3371_v59 }
  0x6d   : > { %v3354_v1 = vld [vmem:[%s4047_s8 + $0x7a0] sm:$0xf]  ;;  %v3652_v2 = vld [vmem:[%s4047_s8 + $0x7ac] sm:$0xf0]  ;;  %v3227_v8 = vor.u32 %v3620_v62, %v3226_v61  ;;  %1877 = vmatpush.bf16.msrb.mxu0 %v2971_v3  ;;  %v248_v3 = vld [vmem:[#allocation2 + $0x18] sm:$0xff] }
  0x6e   : > { %v245_v5 = vld [vmem:[#allocation2] sm:$0xff]  ;;  %v3552_v10 = vld [vmem:[%s4047_s8 + $0x48c] sm:$0xf0]  ;;  %v3355_v14 = vor.u32 %v3652_v2, %v3354_v1  ;;  %1890 = vmatpush.bf16.msrb.mxu1 %v3099_v7 }
  0x6f   : > { %v2954_v9 = vld [vmem:[%s4047_s8 + $0x480] sm:$0xf]  ;;  %v519_v12 = vunpack.c.l.b16 %v245_v5  ;;  %v520_v13 = vunpack.c.h.b16 %v245_v5  ;;  %v3584_v15 = vld [vmem:[%s4047_s8 + $0x58c] sm:$0xf0]  ;;  %1903 = vmatpush.bf16.msrb.mxu2 %v3227_v8 }
  0x70   : > { %v3082_v11 = vld [vmem:[%s4047_s8 + $0x580] sm:$0xf]  ;;  %v3616_v17 = vld [vmem:[%s4047_s8 + $0x68c] sm:$0xf0]  ;;  %v2955_v22 = vor.u32 %v3552_v10, %v2954_v9  ;;  %1916 = vmatpush.bf16.msrb.mxu3 %v3355_v14  ;;  %v3434_v10 = vld [vmem:[%s4047_s8 + $0xe4] sm:$0xf] }
  0x71   : > { %v3210_v16 = vld [vmem:[%s4047_s8 + $0x680] sm:$0xf]  ;;  %v3648_v19 = vld [vmem:[%s4047_s8 + $0x78c] sm:$0xf0]  ;;  %v4154_v20 = vpack.c.b16 %v519_v12, %v519_v12  ;;  %v4157_v21 = vpack.c.b16 %v520_v13, %v520_v13  ;;  %v3083_v23 = vor.u32 %v3584_v15, %v3082_v11  ;;  %v2492_v11 = vld [vmem:[%s4047_s8 + $0xf0] sm:$0xf0] }
  0x72   : > { %v3338_v18 = vld [vmem:[%s4047_s8 + $0x780] sm:$0xf]  ;;  %v3211_v24 = vor.u32 %v3616_v17, %v3210_v16  ;;  %v3548_v26 = vld [vmem:[%s4047_s8 + $0x46c] sm:$0xf0]  ;;  %1878 = vmatpush.bf16.msrb.mxu0 %v2955_v22  ;;  %v3466_v12 = vld [vmem:[%s4047_s8 + $0x1e4] sm:$0xf]  ;;  %v525_v17 = vunpack.c.l.b16 %v248_v3 }
  0x73   : > { %v2938_v25 = vld [vmem:[%s4047_s8 + $0x460] sm:$0xf]  ;;  %v3339_v28 = vor.u32 %v3648_v19, %v3338_v18  ;;  %v3580_v29 = vld [vmem:[%s4047_s8 + $0x56c] sm:$0xf0]  ;;  %1831 = vmatmul.bf16.vlgmr.msra.gmra.mxu0 %v4154_v20  ;;  %1844 = vmatmul.bf16.vlgmr.msra.gmra.mxu1 %v4157_v21  ;;  %v2620_v14 = vld [vmem:[%s4047_s8 + $0x1f0] sm:$0xf0] }
  0x74   : > { %v3066_v27 = vld [vmem:[%s4047_s8 + $0x560] sm:$0xf]  ;;  %v3612_v31 = vld [vmem:[%s4047_s8 + $0x66c] sm:$0xf0]  ;;  %v2939_v34 = vor.u32 %v3548_v26, %v2938_v25  ;;  %1891 = vmatpush.bf16.msrb.mxu1 %v3083_v23  ;;  %1904 = vmatpush.bf16.msrb.mxu2 %v3211_v24  ;;  %v3498_v15 = vld [vmem:[%s4047_s8 + $0x2e4] sm:$0xf]  ;;  %v526_v25 = vunpack.c.h.b16 %v248_v3 }
  0x75   : > { %v3194_v30 = vld [vmem:[%s4047_s8 + $0x660] sm:$0xf]  ;;  %v3644_v33 = vld [vmem:[%s4047_s8 + $0x76c] sm:$0xf0]  ;;  %v3067_v35 = vor.u32 %v3580_v29, %v3066_v27  ;;  %1917 = vmatpush.bf16.msrb.mxu3 %v3339_v28  ;;  %v2748_v16 = vld [vmem:[%s4047_s8 + $0x2f0] sm:$0xf0]  ;;  %v2495_v27 = vor.u32 %v3434_v10, %v2492_v11  ;;  %v2623_v29 = vor.u32 %v3466_v12, %v2620_v14 }
  0x76   : > { %v3322_v32 = vld [vmem:[%s4047_s8 + $0x760] sm:$0xf]  ;;  %v3195_v36 = vor.u32 %v3612_v31, %v3194_v30  ;;  %v3544_v38 = vld [vmem:[%s4047_s8 + $0x44c] sm:$0xf0]  ;;  %1879 = vmatpush.bf16.msrb.mxu0 %v2939_v34  ;;  %v3530_v22 = vld [vmem:[%s4047_s8 + $0x3e4] sm:$0xf]  ;;  %v2751_v30 = vor.u32 %v3498_v15, %v2748_v16 }
  0x77   : > { %v2922_v37 = vld [vmem:[%s4047_s8 + $0x440] sm:$0xf]  ;;  %v3323_v40 = vor.u32 %v3644_v33, %v3322_v32  ;;  %v3576_v41 = vld [vmem:[%s4047_s8 + $0x54c] sm:$0xf0]  ;;  %v2876_v23 = vld [vmem:[%s4047_s8 + $0x3f0] sm:$0xf0] }
  0x78   : > { %v3050_v39 = vld [vmem:[%s4047_s8 + $0x540] sm:$0xf]  ;;  %v3608_v43 = vld [vmem:[%s4047_s8 + $0x64c] sm:$0xf0]  ;;  %v2923_v46 = vor.u32 %v3544_v38, %v2922_v37  ;;  %1892 = vmatpush.bf16.msrb.mxu1 %v3067_v35  ;;  %1905 = vmatpush.bf16.msrb.mxu2 %v3195_v36  ;;  %v3430_v31 = vld [vmem:[%s4047_s8 + $0xc4] sm:$0xf]  ;;  %v2879_v34 = vor.u32 %v3530_v22, %v2876_v23  ;;  %v4207_v38 = vpack.c.b16 %v525_v17, %v525_v17 }
  0x79   : > { %v3178_v42 = vld [vmem:[%s4047_s8 + $0x640] sm:$0xf]  ;;  %v3640_v45 = vld [vmem:[%s4047_s8 + $0x74c] sm:$0xf0]  ;;  %v3051_v47 = vor.u32 %v3576_v41, %v3050_v39  ;;  %1918 = vmatpush.bf16.msrb.mxu3 %v3323_v40  ;;  %v2476_v32 = vld [vmem:[%s4047_s8 + $0xd0] sm:$0xf0] }
  0x7a   : > { %v3306_v44 = vld [vmem:[%s4047_s8 + $0x740] sm:$0xf]  ;;  %v3179_v48 = vor.u32 %v3608_v43, %v3178_v42  ;;  %v3540_v50 = vld [vmem:[%s4047_s8 + $0x42c] sm:$0xf0]  ;;  %1880 = vmatpush.bf16.msrb.mxu0 %v2923_v46  ;;  %v3462_v33 = vld [vmem:[%s4047_s8 + $0x1c4] sm:$0xf]  ;;  %v4213_v42 = vpack.c.b16 %v526_v25, %v526_v25  ;;  %v2479_v43 = vor.u32 %v3430_v31, %v2476_v32 }
  0x7b   : > { %v2906_v49 = vld [vmem:[%s4047_s8 + $0x420] sm:$0xf]  ;;  %v3307_v52 = vor.u32 %v3640_v45, %v3306_v44  ;;  %v3572_v53 = vld [vmem:[%s4047_s8 + $0x52c] sm:$0xf0]  ;;  %v2604_v35 = vld [vmem:[%s4047_s8 + $0x1d0] sm:$0xf0] }
  0x7c   : > { %v3034_v51 = vld [vmem:[%s4047_s8 + $0x520] sm:$0xf]  ;;  %v3604_v55 = vld [vmem:[%s4047_s8 + $0x62c] sm:$0xf0]  ;;  %v2907_v59 = vor.u32 %v3540_v50, %v2906_v49  ;;  %1893 = vmatpush.bf16.msrb.mxu1 %v3051_v47  ;;  %1906 = vmatpush.bf16.msrb.mxu2 %v3179_v48  ;;  %v3494_v36 = vld [vmem:[%s4047_s8 + $0x2c4] sm:$0xf]  ;;  %v2607_v45 = vor.u32 %v3462_v33, %v2604_v35 }
  0x7d   : > { %v3162_v54 = vld [vmem:[%s4047_s8 + $0x620] sm:$0xf]  ;;  %v3636_v57 = vld [vmem:[%s4047_s8 + $0x72c] sm:$0xf0]  ;;  %v3035_v63 = vor.u32 %v3572_v53, %v3034_v51  ;;  %1919 = vmatpush.bf16.msrb.mxu3 %v3307_v52  ;;  %v2732_v37 = vld [vmem:[%s4047_s8 + $0x2d0] sm:$0xf0] }
  0x7e   : > { %v3290_v56 = vld [vmem:[%s4047_s8 + $0x720] sm:$0xf]  ;;  %v3536_v60 = vld [vmem:[%s4047_s8 + $0x40c] sm:$0xf0]  ;;  %v3163_v0 = vor.u32 %v3604_v55, %v3162_v54  ;;  %1881 = vmatpush.bf16.msrb.mxu0 %v2907_v59  ;;  %v3526_v39 = vld [vmem:[%s4047_s8 + $0x3c4] sm:$0xf]  ;;  %v2735_v46 = vor.u32 %v3494_v36, %v2732_v37 }
  0x7f   : > { %v2890_v58 = vld [vmem:[%s4047_s8 + $0x400] sm:$0xf]  ;;  %v3568_v62 = vld [vmem:[%s4047_s8 + $0x50c] sm:$0xf0]  ;;  %v3291_v5 = vor.u32 %v3636_v57, %v3290_v56  ;;  %v2860_v40 = vld [vmem:[%s4047_s8 + $0x3d0] sm:$0xf0] }
  0x80   : > { %v3018_v61 = vld [vmem:[%s4047_s8 + $0x500] sm:$0xf]  ;;  %v3600_v2 = vld [vmem:[%s4047_s8 + $0x60c] sm:$0xf0]  ;;  %v2891_v13 = vor.u32 %v3536_v60, %v2890_v58  ;;  %1894 = vmatpush.bf16.msrb.mxu1 %v3035_v63  ;;  %1907 = vmatpush.bf16.msrb.mxu2 %v3163_v0  ;;  %v3426_v47 = vld [vmem:[%s4047_s8 + $0xa4] sm:$0xf]  ;;  %v2863_v50 = vor.u32 %v3526_v39, %v2860_v40 }
  0x81   : > { %v3146_v1 = vld [vmem:[%s4047_s8 + $0x600] sm:$0xf]  ;;  %v3632_v8 = vld [vmem:[%s4047_s8 + $0x70c] sm:$0xf0]  ;;  %v3019_v18 = vor.u32 %v3568_v62, %v3018_v61  ;;  %1920 = vmatpush.bf16.msrb.mxu3 %v3291_v5  ;;  %v2460_v48 = vld [vmem:[%s4047_s8 + $0xb0] sm:$0xf0] }
  0x82   : > { %v3274_v7 = vld [vmem:[%s4047_s8 + $0x700] sm:$0xf]  ;;  %v247_v9 = vld [vmem:[#allocation2 + $0x10] sm:$0xff]  ;;  %v3147_v19 = vor.u32 %v3600_v2, %v3146_v1  ;;  %1882 = vmatpush.bf16.msrb.mxu0 %v2891_v13  ;;  %v3458_v49 = vld [vmem:[%s4047_s8 + $0x1a4] sm:$0xf]  ;;  %v2463_v56 = vor.u32 %v3426_v47, %v2460_v48 }
  0x83   : > { %v523_v24 = vunpack.c.l.b16 %v247_v9  ;;  %v3275_v26 = vor.u32 %v3632_v8, %v3274_v7  ;;  %v524_v28 = vunpack.c.h.b16 %v247_v9  ;;  %v2588_v51 = vld [vmem:[%s4047_s8 + $0x1b0] sm:$0xf0]  ;;  %v3490_v52 = vld [vmem:[%s4047_s8 + $0x2a4] sm:$0xf] }
  0x84   : > { %1895 = vmatpush.bf16.msrb.mxu1 %v3019_v18  ;;  %1908 = vmatpush.bf16.msrb.mxu2 %v3147_v19  ;;  %v2716_v53 = vld [vmem:[%s4047_s8 + $0x2b0] sm:$0xf0]  ;;  %v3522_v54 = vld [vmem:[%s4047_s8 + $0x3a4] sm:$0xf]  ;;  %v2591_v57 = vor.u32 %v3458_v49, %v2588_v51 }
  0x85   : > { %v4211_v41 = vpack.c.b16 %v523_v24, %v523_v24  ;;  %1921 = vmatpush.bf16.msrb.mxu3 %v3275_v26  ;;  %v4215_v44 = vpack.c.b16 %v524_v28, %v524_v28  ;;  %v2844_v55 = vld [vmem:[%s4047_s8 + $0x3b0] sm:$0xf0]  ;;  %v2719_v58 = vor.u32 %v3490_v52, %v2716_v53  ;;  %v3422_v59 = vld [vmem:[%s4047_s8 + $0x84] sm:$0xf] }
  0x86   : > { %1927 = vmatpush.bf16.msra.mxu0 %v2495_v27  ;;  %v2444_v60 = vld [vmem:[%s4047_s8 + $0x90] sm:$0xf0]  ;;  %v3454_v61 = vld [vmem:[%s4047_s8 + $0x184] sm:$0xf]  ;;  %v2847_v62 = vor.u32 %v3522_v54, %v2844_v55 }
  0x87   : > { %1909 = vmatmul.bf16.vlgmr.msrb.gmra.mxu2 %v4207_v38  ;;  %1883 = vmatmul.bf16.vlgmr.msrb.gmra.mxu0 %v4211_v41  ;;  %v2572_v63 = vld [vmem:[%s4047_s8 + $0x190] sm:$0xf0]  ;;  %v3486_v0 = vld [vmem:[%s4047_s8 + $0x284] sm:$0xf]  ;;  %v2447_v5 = vor.u32 %v3422_v59, %v2444_v60 }
  0x88   : > { %1940 = vmatpush.bf16.msra.mxu1 %v2623_v29  ;;  %1953 = vmatpush.bf16.msra.mxu2 %v2751_v30  ;;  %v2700_v1 = vld [vmem:[%s4047_s8 + $0x290] sm:$0xf0]  ;;  %v3518_v2 = vld [vmem:[%s4047_s8 + $0x384] sm:$0xf]  ;;  %v2575_v7 = vor.u32 %v3454_v61, %v2572_v63 }
  0x89   : > { %1966 = vmatpush.bf16.msra.mxu3 %v2879_v34  ;;  %1896 = vmatmul.bf16.vlgmr.msrb.gmra.mxu1 %v4215_v44  ;;  %v2828_v3 = vld [vmem:[%s4047_s8 + $0x390] sm:$0xf0]  ;;  %v2703_v8 = vor.u32 %v3486_v0, %v2700_v1  ;;  %v3418_v9 = vld [vmem:[%s4047_s8 + $0x64] sm:$0xf] }
  0x8a   : > { %1922 = vmatmul.bf16.vlgmr.msrb.gmra.mxu3 %v4213_v42  ;;  %1928 = vmatpush.bf16.msra.mxu0 %v2479_v43  ;;  %v2428_v10 = vld [vmem:[%s4047_s8 + $0x70] sm:$0xf0]  ;;  %v3450_v11 = vld [vmem:[%s4047_s8 + $0x164] sm:$0xf]  ;;  %v2831_v12 = vor.u32 %v3518_v2, %v2828_v3 }
  0x8b   : > { %v2556_v13 = vld [vmem:[%s4047_s8 + $0x170] sm:$0xf0]  ;;  %v3482_v14 = vld [vmem:[%s4047_s8 + $0x264] sm:$0xf]  ;;  %v2431_v18 = vor.u32 %v3418_v9, %v2428_v10 }
  0x8c   : > { %1941 = vmatpush.bf16.msra.mxu1 %v2607_v45  ;;  %1954 = vmatpush.bf16.msra.mxu2 %v2735_v46  ;;  %v2684_v15 = vld [vmem:[%s4047_s8 + $0x270] sm:$0xf0]  ;;  %v3514_v16 = vld [vmem:[%s4047_s8 + $0x364] sm:$0xf]  ;;  %v2559_v19 = vor.u32 %v3450_v11, %v2556_v13 }
  0x8d   : > { %1967 = vmatpush.bf16.msra.mxu3 %v2863_v50  ;;  %v2812_v17 = vld [vmem:[%s4047_s8 + $0x370] sm:$0xf0]  ;;  %v2687_v22 = vor.u32 %v3482_v14, %v2684_v15  ;;  %v3414_v23 = vld [vmem:[%s4047_s8 + $0x44] sm:$0xf] }
  0x8e   : > { %1929 = vmatpush.bf16.msra.mxu0 %v2463_v56  ;;  %v2412_v24 = vld [vmem:[%s4047_s8 + $0x50] sm:$0xf0]  ;;  %v3446_v25 = vld [vmem:[%s4047_s8 + $0x144] sm:$0xf]  ;;  %v2815_v26 = vor.u32 %v3514_v16, %v2812_v17 }
  0x8f   : > { %v2540_v27 = vld [vmem:[%s4047_s8 + $0x150] sm:$0xf0]  ;;  %v3478_v28 = vld [vmem:[%s4047_s8 + $0x244] sm:$0xf]  ;;  %v2415_v32 = vor.u32 %v3414_v23, %v2412_v24 }
  0x90   : > { %1942 = vmatpush.bf16.msra.mxu1 %v2591_v57  ;;  %1955 = vmatpush.bf16.msra.mxu2 %v2719_v58  ;;  %v2668_v29 = vld [vmem:[%s4047_s8 + $0x250] sm:$0xf0]  ;;  %v3510_v30 = vld [vmem:[%s4047_s8 + $0x344] sm:$0xf]  ;;  %v2543_v33 = vor.u32 %v3446_v25, %v2540_v27 }
  0x91   : > { %1968 = vmatpush.bf16.msra.mxu3 %v2847_v62  ;;  %v2796_v31 = vld [vmem:[%s4047_s8 + $0x350] sm:$0xf0]  ;;  %v2671_v34 = vor.u32 %v3478_v28, %v2668_v29  ;;  %v3410_v35 = vld [vmem:[%s4047_s8 + $0x24] sm:$0xf] }
  0x92   : > { %1930 = vmatpush.bf16.msra.mxu0 %v2447_v5  ;;  %v2396_v36 = vld [vmem:[%s4047_s8 + $0x30] sm:$0xf0]  ;;  %v3442_v37 = vld [vmem:[%s4047_s8 + $0x124] sm:$0xf]  ;;  %v2799_v39 = vor.u32 %v3510_v30, %v2796_v31 }
  0x93   : > { %v2524_v40 = vld [vmem:[%s4047_s8 + $0x130] sm:$0xf0]  ;;  %v3474_v43 = vld [vmem:[%s4047_s8 + $0x224] sm:$0xf]  ;;  %v2399_v48 = vor.u32 %v3410_v35, %v2396_v36 }
  0x94   : > { %1943 = vmatpush.bf16.msra.mxu1 %v2575_v7  ;;  %1956 = vmatpush.bf16.msra.mxu2 %v2703_v8  ;;  %v2652_v45 = vld [vmem:[%s4047_s8 + $0x230] sm:$0xf0]  ;;  %v3506_v46 = vld [vmem:[%s4047_s8 + $0x324] sm:$0xf]  ;;  %v2527_v51 = vor.u32 %v3442_v37, %v2524_v40 }
  0x95   : > { %1969 = vmatpush.bf16.msra.mxu3 %v2831_v12  ;;  %v2780_v47 = vld [vmem:[%s4047_s8 + $0x330] sm:$0xf0]  ;;  %v3406_v49 = vld [vmem:[%s4047_s8 + $0x4] sm:$0xf]  ;;  %v2655_v52 = vor.u32 %v3474_v43, %v2652_v45 }
  0x96   : > { %1931 = vmatpush.bf16.msra.mxu0 %v2431_v18  ;;  %v2380_v50 = vld [vmem:[%s4047_s8 + $0x10] sm:$0xf0]  ;;  %v3438_v53 = vld [vmem:[%s4047_s8 + $0x104] sm:$0xf]  ;;  %v2783_v56 = vor.u32 %v3506_v46, %v2780_v47 }
  0x97   : > { %v2508_v54 = vld [vmem:[%s4047_s8 + $0x110] sm:$0xf0]  ;;  %v3470_v55 = vld [vmem:[%s4047_s8 + $0x204] sm:$0xf]  ;;  %v2383_v63 = vor.u32 %v3406_v49, %v2380_v50 }
  0x98   : > { %1944 = vmatpush.bf16.msra.mxu1 %v2559_v19  ;;  %1957 = vmatpush.bf16.msra.mxu2 %v2687_v22  ;;  %v2636_v57 = vld [vmem:[%s4047_s8 + $0x210] sm:$0xf0]  ;;  %v3502_v58 = vld [vmem:[%s4047_s8 + $0x304] sm:$0xf]  ;;  %v2511_v3 = vor.u32 %v3438_v53, %v2508_v54 }
  0x99   : > { %1970 = vmatpush.bf16.msra.mxu3 %v2815_v26  ;;  %v2764_v59 = vld [vmem:[%s4047_s8 + $0x310] sm:$0xf0]  ;;  %v3562_v60 = vld [vmem:[%s4047_s8 + $0x4e4] sm:$0xf]  ;;  %v2639_v5 = vor.u32 %v3470_v55, %v2636_v57 }
  0x9a   : > { %1932 = vmatpush.bf16.msra.mxu0 %v2415_v32  ;;  %v3004_v61 = vld [vmem:[%s4047_s8 + $0x4f0] sm:$0xf0]  ;;  %v3594_v62 = vld [vmem:[%s4047_s8 + $0x5e4] sm:$0xf]  ;;  %v2767_v9 = vor.u32 %v3502_v58, %v2764_v59 }
  0x9b   : > { %v3132_v0 = vld [vmem:[%s4047_s8 + $0x5f0] sm:$0xf0]  ;;  %v3626_v1 = vld [vmem:[%s4047_s8 + $0x6e4] sm:$0xf]  ;;  %v3007_v10 = vor.u32 %v3562_v60, %v3004_v61 }
  0x9c   : > { %1945 = vmatpush.bf16.msra.mxu1 %v2543_v33  ;;  %1958 = vmatpush.bf16.msra.mxu2 %v2671_v34  ;;  %v3260_v2 = vld [vmem:[%s4047_s8 + $0x6f0] sm:$0xf0]  ;;  %v3658_v7 = vld [vmem:[%s4047_s8 + $0x7e4] sm:$0xf]  ;;  %v3135_v11 = vor.u32 %v3594_v62, %v3132_v0 }
  0x9d   : > { %1971 = vmatpush.bf16.msra.mxu3 %v2799_v39  ;;  %v3388_v8 = vld [vmem:[%s4047_s8 + $0x7f0] sm:$0xf0]  ;;  %v3263_v12 = vor.u32 %v3626_v1, %v3260_v2  ;;  %v3558_v13 = vld [vmem:[%s4047_s8 + $0x4c4] sm:$0xf] }
  0x9e   : > { %1933 = vmatpush.bf16.msra.mxu0 %v2399_v48  ;;  %v2988_v14 = vld [vmem:[%s4047_s8 + $0x4d0] sm:$0xf0]  ;;  %v3590_v15 = vld [vmem:[%s4047_s8 + $0x5c4] sm:$0xf]  ;;  %v3391_v16 = vor.u32 %v3658_v7, %v3388_v8 }
  0x9f   : > { %v3116_v17 = vld [vmem:[%s4047_s8 + $0x5d0] sm:$0xf0]  ;;  %v3622_v18 = vld [vmem:[%s4047_s8 + $0x6c4] sm:$0xf]  ;;  %v2991_v24 = vor.u32 %v3558_v13, %v2988_v14 }
  0xa0   : > { %1946 = vmatpush.bf16.msra.mxu1 %v2527_v51  ;;  %1959 = vmatpush.bf16.msra.mxu2 %v2655_v52  ;;  %v3244_v19 = vld [vmem:[%s4047_s8 + $0x6d0] sm:$0xf0]  ;;  %v3654_v22 = vld [vmem:[%s4047_s8 + $0x7c4] sm:$0xf]  ;;  %v3119_v25 = vor.u32 %v3590_v15, %v3116_v17 }
  0xa1   : > { %1972 = vmatpush.bf16.msra.mxu3 %v2783_v56  ;;  %v3372_v23 = vld [vmem:[%s4047_s8 + $0x7d0] sm:$0xf0]  ;;  %v3247_v26 = vor.u32 %v3622_v18, %v3244_v19  ;;  %v3554_v27 = vld [vmem:[%s4047_s8 + $0x4a4] sm:$0xf] }
  0xa2   : > { %1934 = vmatpush.bf16.msra.mxu0 %v2383_v63  ;;  %v2972_v28 = vld [vmem:[%s4047_s8 + $0x4b0] sm:$0xf0]  ;;  %v3586_v29 = vld [vmem:[%s4047_s8 + $0x5a4] sm:$0xf]  ;;  %v3375_v30 = vor.u32 %v3654_v22, %v3372_v23 }
  0xa3   : > { %v3100_v31 = vld [vmem:[%s4047_s8 + $0x5b0] sm:$0xf0]  ;;  %v3618_v32 = vld [vmem:[%s4047_s8 + $0x6a4] sm:$0xf]  ;;  %v2975_v36 = vor.u32 %v3554_v27, %v2972_v28 }
  0xa4   : > { %1947 = vmatpush.bf16.msra.mxu1 %v2511_v3  ;;  %1960 = vmatpush.bf16.msra.mxu2 %v2639_v5  ;;  %v3228_v33 = vld [vmem:[%s4047_s8 + $0x6b0] sm:$0xf0]  ;;  %v3650_v34 = vld [vmem:[%s4047_s8 + $0x7a4] sm:$0xf]  ;;  %v3103_v37 = vor.u32 %v3586_v29, %v3100_v31 }
  0xa5   : > { %1973 = vmatpush.bf16.msra.mxu3 %v2767_v9  ;;  %v3356_v35 = vld [vmem:[%s4047_s8 + $0x7b0] sm:$0xf0]  ;;  %1935 = vmatmul.bf16.vlgmr.msra.gmra.mxu0 %v4154_v20  ;;  %v3231_v39 = vor.u32 %v3618_v32, %v3228_v33  ;;  %v3550_v40 = vld [vmem:[%s4047_s8 + $0x484] sm:$0xf] }
  0xa6   : > { %1979 = vmatpush.bf16.msrb.mxu0 %v3007_v10  ;;  %v2956_v43 = vld [vmem:[%s4047_s8 + $0x490] sm:$0xf0]  ;;  %v3582_v45 = vld [vmem:[%s4047_s8 + $0x584] sm:$0xf]  ;;  %v3359_v46 = vor.u32 %v3650_v34, %v3356_v35 }
  0xa7   : > { %1961 = vmatmul.bf16.vlgmr.msra.gmra.mxu2 %v4141_v4  ;;  %1948 = vmatmul.bf16.vlgmr.msra.gmra.mxu1 %v4157_v21  ;;  %v3084_v47 = vld [vmem:[%s4047_s8 + $0x590] sm:$0xf0]  ;;  %v3614_v48 = vld [vmem:[%s4047_s8 + $0x684] sm:$0xf]  ;;  %v2959_v52 = vor.u32 %v3550_v40, %v2956_v43  ;;  %v2498_v43 = vld [vmem:[%s4047_s8 + $0xe8] sm:$0xf] }
  0xa8   : > { %1992 = vmatpush.bf16.msrb.mxu1 %v3135_v11  ;;  %2005 = vmatpush.bf16.msrb.mxu2 %v3263_v12  ;;  %v3212_v49 = vld [vmem:[%s4047_s8 + $0x690] sm:$0xf0]  ;;  %v3646_v50 = vld [vmem:[%s4047_s8 + $0x784] sm:$0xf]  ;;  %v3087_v53 = vor.u32 %v3582_v45, %v3084_v47  ;;  %v3437_v45 = vld [vmem:[%s4047_s8 + $0xf4] sm:$0xf0] }
  0xa9   : > { %2018 = vmatpush.bf16.msrb.mxu3 %v3391_v16  ;;  %v3340_v51 = vld [vmem:[%s4047_s8 + $0x790] sm:$0xf0]  ;;  %v3215_v54 = vor.u32 %v3614_v48, %v3212_v49  ;;  %v3546_v55 = vld [vmem:[%s4047_s8 + $0x464] sm:$0xf]  ;;  %v3469_v48 = vld [vmem:[%s4047_s8 + $0x1f4] sm:$0xf0] }
  0xaa   : > { %1974 = vmatmul.bf16.vlgmr.msra.gmra.mxu3 %v4143_v6  ;;  %1980 = vmatpush.bf16.msrb.mxu0 %v2991_v24  ;;  %v2940_v56 = vld [vmem:[%s4047_s8 + $0x470] sm:$0xf0]  ;;  %v3578_v57 = vld [vmem:[%s4047_s8 + $0x564] sm:$0xf]  ;;  %v3343_v58 = vor.u32 %v3646_v50, %v3340_v51  ;;  %v2754_v49 = vld [vmem:[%s4047_s8 + $0x2e8] sm:$0xf] }
  0xab   : > { %v3068_v59 = vld [vmem:[%s4047_s8 + $0x570] sm:$0xf0]  ;;  %v3610_v60 = vld [vmem:[%s4047_s8 + $0x664] sm:$0xf]  ;;  %v2943_v0 = vor.u32 %v3546_v55, %v2940_v56  ;;  %v3501_v50 = vld [vmem:[%s4047_s8 + $0x2f4] sm:$0xf0]  ;;  %v2499_v56 = vor.u32 %v3437_v45, %v2498_v43 }
  0xac   : > { %1993 = vmatpush.bf16.msrb.mxu1 %v3119_v25  ;;  %2006 = vmatpush.bf16.msrb.mxu2 %v3247_v26  ;;  %v3196_v61 = vld [vmem:[%s4047_s8 + $0x670] sm:$0xf0]  ;;  %v3642_v62 = vld [vmem:[%s4047_s8 + $0x764] sm:$0xf]  ;;  %v3071_v1 = vor.u32 %v3578_v57, %v3068_v59  ;;  %v2482_v59 = vld [vmem:[%s4047_s8 + $0xc8] sm:$0xf] }
  0xad   : > { %2019 = vmatpush.bf16.msrb.mxu3 %v3375_v30  ;;  %v3324_v63 = vld [vmem:[%s4047_s8 + $0x770] sm:$0xf0]  ;;  %v3199_v2 = vor.u32 %v3610_v60, %v3196_v61  ;;  %v3542_v3 = vld [vmem:[%s4047_s8 + $0x444] sm:$0xf]  ;;  %v3433_v60 = vld [vmem:[%s4047_s8 + $0xd4] sm:$0xf0] }
  0xae   : > { %1981 = vmatpush.bf16.msrb.mxu0 %v2975_v36  ;;  %v2924_v5 = vld [vmem:[%s4047_s8 + $0x450] sm:$0xf0]  ;;  %v3574_v7 = vld [vmem:[%s4047_s8 + $0x544] sm:$0xf]  ;;  %v3327_v8 = vor.u32 %v3642_v62, %v3324_v63  ;;  %v2610_v61 = vld [vmem:[%s4047_s8 + $0x1c8] sm:$0xf] }
  0xaf   : > { %v3052_v9 = vld [vmem:[%s4047_s8 + $0x550] sm:$0xf0]  ;;  %v3606_v10 = vld [vmem:[%s4047_s8 + $0x644] sm:$0xf]  ;;  %v2927_v14 = vor.u32 %v3542_v3, %v2924_v5  ;;  %v3465_v63 = vld [vmem:[%s4047_s8 + $0x1d4] sm:$0xf0]  ;;  %v2483_v5 = vor.u32 %v3433_v60, %v2482_v59 }
  0xb0   : > { %1994 = vmatpush.bf16.msrb.mxu1 %v3103_v37  ;;  %2007 = vmatpush.bf16.msrb.mxu2 %v3231_v39  ;;  %v3180_v11 = vld [vmem:[%s4047_s8 + $0x650] sm:$0xf0]  ;;  %v3638_v12 = vld [vmem:[%s4047_s8 + $0x744] sm:$0xf]  ;;  %v3055_v15 = vor.u32 %v3574_v7, %v3052_v9  ;;  %v3529_v3 = vld [vmem:[%s4047_s8 + $0x3d4] sm:$0xf0]  ;;  %v2611_v7 = vor.u32 %v3465_v63, %v2610_v61 }
  0xb1   : > { %2020 = vmatpush.bf16.msrb.mxu3 %v3359_v46  ;;  %v3308_v13 = vld [vmem:[%s4047_s8 + $0x750] sm:$0xf0]  ;;  %v3183_v16 = vor.u32 %v3606_v10, %v3180_v11  ;;  %v3538_v17 = vld [vmem:[%s4047_s8 + $0x424] sm:$0xf]  ;;  %v2626_v46 = vld [vmem:[%s4047_s8 + $0x1e8] sm:$0xf] }
  0xb2   : > { %1982 = vmatpush.bf16.msrb.mxu0 %v2959_v52  ;;  %v2908_v18 = vld [vmem:[%s4047_s8 + $0x430] sm:$0xf0]  ;;  %v3570_v19 = vld [vmem:[%s4047_s8 + $0x524] sm:$0xf]  ;;  %v3311_v22 = vor.u32 %v3638_v12, %v3308_v13  ;;  %v2627_v57 = vor.u32 %v3469_v48, %v2626_v46  ;;  %v2466_v9 = vld [vmem:[%s4047_s8 + $0xa8] sm:$0xf] }
  0xb3   : > { %v3036_v23 = vld [vmem:[%s4047_s8 + $0x530] sm:$0xf0]  ;;  %v3602_v24 = vld [vmem:[%s4047_s8 + $0x624] sm:$0xf]  ;;  %v2911_v28 = vor.u32 %v3538_v17, %v2908_v18  ;;  %v3429_v10 = vld [vmem:[%s4047_s8 + $0xb4] sm:$0xf0] }
  0xb4   : > { %1995 = vmatpush.bf16.msrb.mxu1 %v3087_v53  ;;  %2008 = vmatpush.bf16.msrb.mxu2 %v3215_v54  ;;  %v3164_v25 = vld [vmem:[%s4047_s8 + $0x630] sm:$0xf0]  ;;  %v3634_v26 = vld [vmem:[%s4047_s8 + $0x724] sm:$0xf]  ;;  %v3039_v31 = vor.u32 %v3570_v19, %v3036_v23  ;;  %v2882_v53 = vld [vmem:[%s4047_s8 + $0x3e8] sm:$0xf]  ;;  %v2467_v18 = vor.u32 %v3429_v10, %v2466_v9 }
  0xb5   : > { %2021 = vmatpush.bf16.msrb.mxu3 %v3343_v58  ;;  %v3292_v27 = vld [vmem:[%s4047_s8 + $0x730] sm:$0xf0]  ;;  %v3534_v29 = vld [vmem:[%s4047_s8 + $0x404] sm:$0xf]  ;;  %v3167_v32 = vor.u32 %v3602_v24, %v3164_v25  ;;  %v3533_v54 = vld [vmem:[%s4047_s8 + $0x3f4] sm:$0xf0]  ;;  %v2755_v58 = vor.u32 %v3501_v50, %v2754_v49 }
  0xb6   : > { %1983 = vmatpush.bf16.msrb.mxu0 %v2943_v0  ;;  %v2892_v30 = vld [vmem:[%s4047_s8 + $0x410] sm:$0xf0]  ;;  %v3566_v33 = vld [vmem:[%s4047_s8 + $0x504] sm:$0xf]  ;;  %v3295_v36 = vor.u32 %v3634_v26, %v3292_v27  ;;  %v2883_v62 = vor.u32 %v3533_v54, %v2882_v53  ;;  %v2738_v0 = vld [vmem:[%s4047_s8 + $0x2c8] sm:$0xf] }
  0xb7   : > { %v3020_v34 = vld [vmem:[%s4047_s8 + $0x510] sm:$0xf0]  ;;  %v3598_v35 = vld [vmem:[%s4047_s8 + $0x604] sm:$0xf]  ;;  %v2895_v47 = vor.u32 %v3534_v29, %v2892_v30  ;;  %v2594_v11 = vld [vmem:[%s4047_s8 + $0x1a8] sm:$0xf] }
  0xb8   : > { %1996 = vmatpush.bf16.msrb.mxu1 %v3071_v1  ;;  %2009 = vmatpush.bf16.msrb.mxu2 %v3199_v2  ;;  %v3148_v37 = vld [vmem:[%s4047_s8 + $0x610] sm:$0xf0]  ;;  %v3630_v39 = vld [vmem:[%s4047_s8 + $0x704] sm:$0xf]  ;;  %v3023_v51 = vor.u32 %v3566_v33, %v3020_v34  ;;  %v3497_v1 = vld [vmem:[%s4047_s8 + $0x2d4] sm:$0xf0] }
  0xb9   : > { %2022 = vmatpush.bf16.msrb.mxu3 %v3327_v8  ;;  %v3276_v40 = vld [vmem:[%s4047_s8 + $0x710] sm:$0xf0]  ;;  %v3151_v52 = vor.u32 %v3598_v35, %v3148_v37  ;;  %v2866_v2 = vld [vmem:[%s4047_s8 + $0x3c8] sm:$0xf]  ;;  %v2739_v8 = vor.u32 %v3497_v1, %v2738_v0  ;;  %v3461_v13 = vld [vmem:[%s4047_s8 + $0x1b4] sm:$0xf0] }
  0xba   : > { %1984 = vmatpush.bf16.msrb.mxu0 %v2927_v14  ;;  %v3279_v55 = vor.u32 %v3630_v39, %v3276_v40  ;;  %v2867_v12 = vor.u32 %v3529_v3, %v2866_v2  ;;  %v2722_v14 = vld [vmem:[%s4047_s8 + $0x2a8] sm:$0xf]  ;;  %v3525_v17 = vld [vmem:[%s4047_s8 + $0x3b4] sm:$0xf0]  ;;  %v2595_v19 = vor.u32 %v3461_v13, %v2594_v11 }
  0xbb   : > { %v2450_v23 = vld [vmem:[%s4047_s8 + $0x88] sm:$0xf]  ;;  %v3425_v24 = vld [vmem:[%s4047_s8 + $0x94] sm:$0xf0] }
  0xbc   : > { %1997 = vmatpush.bf16.msrb.mxu1 %v3055_v15  ;;  %2010 = vmatpush.bf16.msrb.mxu2 %v3183_v16  ;;  %v3493_v15 = vld [vmem:[%s4047_s8 + $0x2b4] sm:$0xf0]  ;;  %v2850_v16 = vld [vmem:[%s4047_s8 + $0x3a8] sm:$0xf] }
  0xbd   : > { %2023 = vmatpush.bf16.msrb.mxu3 %v3311_v22  ;;  %v2723_v22 = vor.u32 %v3493_v15, %v2722_v14  ;;  %v2578_v25 = vld [vmem:[%s4047_s8 + $0x188] sm:$0xf]  ;;  %v2851_v26 = vor.u32 %v3525_v17, %v2850_v16  ;;  %v3457_v27 = vld [vmem:[%s4047_s8 + $0x194] sm:$0xf0] }
  0xbe   : > { %1985 = vmatpush.bf16.msrb.mxu0 %v2911_v28  ;;  %v2706_v28 = vld [vmem:[%s4047_s8 + $0x288] sm:$0xf]  ;;  %v3489_v29 = vld [vmem:[%s4047_s8 + $0x294] sm:$0xf0]  ;;  %v2579_v33 = vor.u32 %v3457_v27, %v2578_v25 }
  0xbf   : > { %v2834_v30 = vld [vmem:[%s4047_s8 + $0x388] sm:$0xf]  ;;  %v2707_v34 = vor.u32 %v3489_v29, %v2706_v28  ;;  %v3453_v40 = vld [vmem:[%s4047_s8 + $0x174] sm:$0xf0] }
  0xc0   : > { %1998 = vmatpush.bf16.msrb.mxu1 %v3039_v31  ;;  %2011 = vmatpush.bf16.msrb.mxu2 %v3167_v32  ;;  %v3521_v31 = vld [vmem:[%s4047_s8 + $0x394] sm:$0xf0]  ;;  %v2451_v32 = vor.u32 %v3425_v24, %v2450_v23  ;;  %v2434_v35 = vld [vmem:[%s4047_s8 + $0x68] sm:$0xf] }
  0xc1   : > { %2024 = vmatpush.bf16.msrb.mxu3 %v3295_v36  ;;  %v3421_v36 = vld [vmem:[%s4047_s8 + $0x74] sm:$0xf0]  ;;  %v2562_v37 = vld [vmem:[%s4047_s8 + $0x168] sm:$0xf]  ;;  %v2835_v39 = vor.u32 %v3521_v31, %v2834_v30 }
  0xc2   : > { %1986 = vmatpush.bf16.msrb.mxu0 %v2895_v47  ;;  %v2690_v43 = vld [vmem:[%s4047_s8 + $0x268] sm:$0xf]  ;;  %v3485_v45 = vld [vmem:[%s4047_s8 + $0x274] sm:$0xf0]  ;;  %v2435_v48 = vor.u32 %v3421_v36, %v2434_v35  ;;  %v2563_v49 = vor.u32 %v3453_v40, %v2562_v37 }
  0xc3   : > { %v2818_v46 = vld [vmem:[%s4047_s8 + $0x368] sm:$0xf]  ;;  %v3517_v47 = vld [vmem:[%s4047_s8 + $0x374] sm:$0xf0]  ;;  %v2691_v50 = vor.u32 %v3485_v45, %v2690_v43 }
  0xc4   : > { %1999 = vmatpush.bf16.msrb.mxu1 %v3023_v51  ;;  %2012 = vmatpush.bf16.msrb.mxu2 %v3151_v52  ;;  %v2418_v51 = vld [vmem:[%s4047_s8 + $0x48] sm:$0xf]  ;;  %v3417_v52 = vld [vmem:[%s4047_s8 + $0x54] sm:$0xf0]  ;;  %v2819_v54 = vor.u32 %v3517_v47, %v2818_v46 }
  0xc5   : > { %2025 = vmatpush.bf16.msrb.mxu3 %v3279_v55  ;;  %1987 = vmatmul.bf16.vlgmr.msrb.gmra.mxu0 %v4211_v41  ;;  %v2546_v53 = vld [vmem:[%s4047_s8 + $0x148] sm:$0xf]  ;;  %v3449_v55 = vld [vmem:[%s4047_s8 + $0x154] sm:$0xf0]  ;;  %v2419_v60 = vor.u32 %v3417_v52, %v2418_v51 }
  0xc6   : > { %2031 = vmatpush.bf16.msra.mxu0 %v2499_v56  ;;  %v2674_v56 = vld [vmem:[%s4047_s8 + $0x248] sm:$0xf]  ;;  %v3513_v59 = vld [vmem:[%s4047_s8 + $0x354] sm:$0xf0]  ;;  %v2547_v61 = vor.u32 %v3449_v55, %v2546_v53 }
  0xc7   : > { %2013 = vmatmul.bf16.vlgmr.msrb.gmra.mxu2 %v4207_v38  ;;  %2000 = vmatmul.bf16.vlgmr.msrb.gmra.mxu1 %v4215_v44  ;;  %v2402_v63 = vld [vmem:[%s4047_s8 + $0x28] sm:$0xf]  ;;  %v3413_v0 = vld [vmem:[%s4047_s8 + $0x34] sm:$0xf0] }
  0xc8   : > { %2044 = vmatpush.bf16.msra.mxu1 %v2627_v57  ;;  %2057 = vmatpush.bf16.msra.mxu2 %v2755_v58  ;;  %v3481_v57 = vld [vmem:[%s4047_s8 + $0x254] sm:$0xf0]  ;;  %v2802_v58 = vld [vmem:[%s4047_s8 + $0x348] sm:$0xf]  ;;  %v2403_v10 = vor.u32 %v3413_v0, %v2402_v63 }
  0xc9   : > { %2070 = vmatpush.bf16.msra.mxu3 %v2883_v62  ;;  %v2675_v62 = vor.u32 %v3481_v57, %v2674_v56  ;;  %v2530_v1 = vld [vmem:[%s4047_s8 + $0x128] sm:$0xf]  ;;  %v2803_v2 = vor.u32 %v3513_v59, %v2802_v58  ;;  %v3445_v3 = vld [vmem:[%s4047_s8 + $0x134] sm:$0xf0] }
  0xca   : > { %2026 = vmatmul.bf16.vlgmr.msrb.gmra.mxu3 %v4213_v42  ;;  %2032 = vmatpush.bf16.msra.mxu0 %v2483_v5  ;;  %v2658_v5 = vld [vmem:[%s4047_s8 + $0x228] sm:$0xf]  ;;  %v3509_v9 = vld [vmem:[%s4047_s8 + $0x334] sm:$0xf0]  ;;  %v2531_v13 = vor.u32 %v3445_v3, %v2530_v1 }
  0xcb   : > { %v2386_v11 = vld [vmem:[%s4047_s8 + $0x8] sm:$0xf]  ;;  %v3441_v16 = vld [vmem:[%s4047_s8 + $0x114] sm:$0xf0] }
  0xcc   : > { %2045 = vmatpush.bf16.msra.mxu1 %v2611_v7  ;;  %2058 = vmatpush.bf16.msra.mxu2 %v2739_v8  ;;  %v3477_v7 = vld [vmem:[%s4047_s8 + $0x234] sm:$0xf0]  ;;  %v2786_v8 = vld [vmem:[%s4047_s8 + $0x328] sm:$0xf] }
  0xcd   : > { %2071 = vmatpush.bf16.msra.mxu3 %v2867_v12  ;;  %v3409_v12 = vld [vmem:[%s4047_s8 + $0x14] sm:$0xf0]  ;;  %v2659_v14 = vor.u32 %v3477_v7, %v2658_v5  ;;  %v2514_v15 = vld [vmem:[%s4047_s8 + $0x108] sm:$0xf] }
  0xce   : > { %2033 = vmatpush.bf16.msra.mxu0 %v2467_v18  ;;  %v2642_v17 = vld [vmem:[%s4047_s8 + $0x208] sm:$0xf]  ;;  %v2787_v18 = vor.u32 %v3509_v9, %v2786_v8  ;;  %v3505_v23 = vld [vmem:[%s4047_s8 + $0x314] sm:$0xf0]  ;;  %v2387_v27 = vor.u32 %v3409_v12, %v2386_v11  ;;  %v2515_v31 = vor.u32 %v3441_v16, %v2514_v15 }
  0xcf   : > { %v3010_v24 = vld [vmem:[%s4047_s8 + $0x4e8] sm:$0xf]  ;;  %v3565_v25 = vld [vmem:[%s4047_s8 + $0x4f4] sm:$0xf0] }
  0xd0   : > { %2046 = vmatpush.bf16.msra.mxu1 %v2595_v19  ;;  %2059 = vmatpush.bf16.msra.mxu2 %v2723_v22  ;;  %v3473_v19 = vld [vmem:[%s4047_s8 + $0x214] sm:$0xf0]  ;;  %v2770_v22 = vld [vmem:[%s4047_s8 + $0x308] sm:$0xf]  ;;  %v3011_v36 = vor.u32 %v3565_v25, %v3010_v24 }
  0xd1   : > { %2072 = vmatpush.bf16.msra.mxu3 %v2851_v26  ;;  %v3138_v26 = vld [vmem:[%s4047_s8 + $0x5e8] sm:$0xf]  ;;  %v3597_v28 = vld [vmem:[%s4047_s8 + $0x5f4] sm:$0xf0]  ;;  %v2771_v35 = vor.u32 %v3505_v23, %v2770_v22 }
  0xd2   : > { %2034 = vmatpush.bf16.msra.mxu0 %v2451_v32  ;;  %v3266_v29 = vld [vmem:[%s4047_s8 + $0x6e8] sm:$0xf]  ;;  %v3629_v30 = vld [vmem:[%s4047_s8 + $0x6f4] sm:$0xf0]  ;;  %v2643_v32 = vor.u32 %v3473_v19, %v2642_v17  ;;  %v3139_v37 = vor.u32 %v3597_v28, %v3138_v26 }
  0xd3   : > { %v2994_v40 = vld [vmem:[%s4047_s8 + $0x4c8] sm:$0xf]  ;;  %v3561_v43 = vld [vmem:[%s4047_s8 + $0x4d4] sm:$0xf0] }
  0xd4   : > { %2047 = vmatpush.bf16.msra.mxu1 %v2579_v33  ;;  %2060 = vmatpush.bf16.msra.mxu2 %v2707_v34  ;;  %v3394_v33 = vld [vmem:[%s4047_s8 + $0x7e8] sm:$0xf]  ;;  %v3661_v34 = vld [vmem:[%s4047_s8 + $0x7f4] sm:$0xf0]  ;;  %v2995_v52 = vor.u32 %v3561_v43, %v2994_v40 }
  0xd5   : > { %2073 = vmatpush.bf16.msra.mxu3 %v2835_v39  ;;  %v3267_v39 = vor.u32 %v3629_v30, %v3266_v29  ;;  %v3122_v45 = vld [vmem:[%s4047_s8 + $0x5c8] sm:$0xf]  ;;  %v3395_v46 = vor.u32 %v3661_v34, %v3394_v33  ;;  %v3593_v47 = vld [vmem:[%s4047_s8 + $0x5d4] sm:$0xf0] }
  0xd6   : > { %2035 = vmatpush.bf16.msra.mxu0 %v2435_v48  ;;  %v3250_v48 = vld [vmem:[%s4047_s8 + $0x6c8] sm:$0xf]  ;;  %v3657_v51 = vld [vmem:[%s4047_s8 + $0x7d4] sm:$0xf0]  ;;  %v3123_v53 = vor.u32 %v3593_v47, %v3122_v45 }
  0xd7   : > { %v2978_v55 = vld [vmem:[%s4047_s8 + $0x4a8] sm:$0xf]  ;;  %v3557_v56 = vld [vmem:[%s4047_s8 + $0x4b4] sm:$0xf0] }
  0xd8   : > { %2048 = vmatpush.bf16.msra.mxu1 %v2563_v49  ;;  %2061 = vmatpush.bf16.msra.mxu2 %v2691_v50  ;;  %v3625_v49 = vld [vmem:[%s4047_s8 + $0x6d4] sm:$0xf0]  ;;  %v3378_v50 = vld [vmem:[%s4047_s8 + $0x7c8] sm:$0xf]  ;;  %v2979_v0 = vor.u32 %v3557_v56, %v2978_v55 }
  0xd9   : > { %2074 = vmatpush.bf16.msra.mxu3 %v2819_v54  ;;  %v3251_v54 = vor.u32 %v3625_v49, %v3250_v48  ;;  %v3106_v57 = vld [vmem:[%s4047_s8 + $0x5a8] sm:$0xf]  ;;  %v3379_v58 = vor.u32 %v3657_v51, %v3378_v50  ;;  %v3589_v59 = vld [vmem:[%s4047_s8 + $0x5b4] sm:$0xf0] }
  0xda   : > { %2036 = vmatpush.bf16.msra.mxu0 %v2419_v60  ;;  %v3234_v60 = vld [vmem:[%s4047_s8 + $0x6a8] sm:$0xf]  ;;  %v3653_v63 = vld [vmem:[%s4047_s8 + $0x7b4] sm:$0xf0]  ;;  %v3107_v1 = vor.u32 %v3589_v59, %v3106_v57 }
  0xdb   : > { %v2962_v3 = vld [vmem:[%s4047_s8 + $0x488] sm:$0xf]  ;;  %v3553_v5 = vld [vmem:[%s4047_s8 + $0x494] sm:$0xf0] }
  0xdc   : > { %2049 = vmatpush.bf16.msra.mxu1 %v2547_v61  ;;  %2062 = vmatpush.bf16.msra.mxu2 %v2675_v62  ;;  %v3621_v61 = vld [vmem:[%s4047_s8 + $0x6b4] sm:$0xf0]  ;;  %v3362_v62 = vld [vmem:[%s4047_s8 + $0x7a8] sm:$0xf] }
  0xdd   : > { %2075 = vmatpush.bf16.msra.mxu3 %v2803_v2  ;;  %v3235_v2 = vor.u32 %v3621_v61, %v3234_v60  ;;  %v3090_v7 = vld [vmem:[%s4047_s8 + $0x588] sm:$0xf]  ;;  %v3363_v8 = vor.u32 %v3653_v63, %v3362_v62  ;;  %v3585_v9 = vld [vmem:[%s4047_s8 + $0x594] sm:$0xf0] }
  0xde   : > { %2037 = vmatpush.bf16.msra.mxu0 %v2403_v10  ;;  %v3218_v10 = vld [vmem:[%s4047_s8 + $0x688] sm:$0xf]  ;;  %v3617_v11 = vld [vmem:[%s4047_s8 + $0x694] sm:$0xf0]  ;;  %v3091_v15 = vor.u32 %v3585_v9, %v3090_v7 }
  0xdf   : > { %v3346_v12 = vld [vmem:[%s4047_s8 + $0x788] sm:$0xf]  ;;  %v3219_v16 = vor.u32 %v3617_v11, %v3218_v10  ;;  %v3581_v23 = vld [vmem:[%s4047_s8 + $0x574] sm:$0xf0] }
  0xe0   : > { %2050 = vmatpush.bf16.msra.mxu1 %v2531_v13  ;;  %2063 = vmatpush.bf16.msra.mxu2 %v2659_v14  ;;  %v3649_v13 = vld [vmem:[%s4047_s8 + $0x794] sm:$0xf0]  ;;  %v2963_v14 = vor.u32 %v3553_v5, %v2962_v3  ;;  %v2946_v17 = vld [vmem:[%s4047_s8 + $0x468] sm:$0xf] }
  0xe1   : > { %2076 = vmatpush.bf16.msra.mxu3 %v2787_v18  ;;  %v3549_v18 = vld [vmem:[%s4047_s8 + $0x474] sm:$0xf0]  ;;  %v3074_v19 = vld [vmem:[%s4047_s8 + $0x568] sm:$0xf]  ;;  %v3347_v22 = vor.u32 %v3649_v13, %v3346_v12  ;;  %v3435_v12 = vld [vmem:[%s4047_s8 + $0xec] sm:$0xf] }
  0xe2   : > { %2038 = vmatpush.bf16.msra.mxu0 %v2387_v27  ;;  %v3202_v24 = vld [vmem:[%s4047_s8 + $0x668] sm:$0xf]  ;;  %v3613_v25 = vld [vmem:[%s4047_s8 + $0x674] sm:$0xf0]  ;;  %v2947_v28 = vor.u32 %v3549_v18, %v2946_v17  ;;  %v3075_v29 = vor.u32 %v3581_v23, %v3074_v19  ;;  %v2500_v13 = vld [vmem:[%s4047_s8 + $0xf8] sm:$0xf0] }
  0xe3   : > { %v3330_v26 = vld [vmem:[%s4047_s8 + $0x768] sm:$0xf]  ;;  %v3645_v27 = vld [vmem:[%s4047_s8 + $0x774] sm:$0xf0]  ;;  %v3203_v30 = vor.u32 %v3613_v25, %v3202_v24  ;;  %v2628_v18 = vld [vmem:[%s4047_s8 + $0x1f8] sm:$0xf0] }
  0xe4   : > { %2051 = vmatpush.bf16.msra.mxu1 %v2515_v31  ;;  %2064 = vmatpush.bf16.msra.mxu2 %v2643_v32  ;;  %v2930_v31 = vld [vmem:[%s4047_s8 + $0x448] sm:$0xf]  ;;  %v3545_v32 = vld [vmem:[%s4047_s8 + $0x454] sm:$0xf0]  ;;  %v3331_v34 = vor.u32 %v3645_v27, %v3330_v26  ;;  %v3499_v19 = vld [vmem:[%s4047_s8 + $0x2ec] sm:$0xf] }
  0xe5   : > { %2077 = vmatpush.bf16.msra.mxu3 %v2771_v35  ;;  %2039 = vmatmul.bf16.vlgmr.msra.gmra.mxu0 %v4154_v20  ;;  %v3058_v33 = vld [vmem:[%s4047_s8 + $0x548] sm:$0xf]  ;;  %v3577_v35 = vld [vmem:[%s4047_s8 + $0x554] sm:$0xf0]  ;;  %v2931_v45 = vor.u32 %v3545_v32, %v2930_v31  ;;  %v3531_v26 = vld [vmem:[%s4047_s8 + $0x3ec] sm:$0xf] }
  0xe6   : > { %2083 = vmatpush.bf16.msrb.mxu0 %v3011_v36  ;;  %v3186_v36 = vld [vmem:[%s4047_s8 + $0x648] sm:$0xf]  ;;  %v3641_v40 = vld [vmem:[%s4047_s8 + $0x754] sm:$0xf0]  ;;  %v3059_v48 = vor.u32 %v3577_v35, %v3058_v33  ;;  %v2884_v27 = vld [vmem:[%s4047_s8 + $0x3f8] sm:$0xf0] }
  0xe7   : > { %2065 = vmatmul.bf16.vlgmr.msra.gmra.mxu2 %v4141_v4  ;;  %2052 = vmatmul.bf16.vlgmr.msra.gmra.mxu1 %v4157_v21  ;;  %v2914_v50 = vld [vmem:[%s4047_s8 + $0x428] sm:$0xf]  ;;  %v3541_v51 = vld [vmem:[%s4047_s8 + $0x434] sm:$0xf0]  ;;  %v3431_v35 = vld [vmem:[%s4047_s8 + $0xcc] sm:$0xf] }
  0xe8   : > { %2096 = vmatpush.bf16.msrb.mxu1 %v3139_v37  ;;  %2109 = vmatpush.bf16.msrb.mxu2 %v3267_v39  ;;  %v3609_v37 = vld [vmem:[%s4047_s8 + $0x654] sm:$0xf0]  ;;  %v3314_v39 = vld [vmem:[%s4047_s8 + $0x748] sm:$0xf]  ;;  %v2915_v62 = vor.u32 %v3541_v51, %v2914_v50 }
  0xe9   : > { %2122 = vmatpush.bf16.msrb.mxu3 %v3395_v46  ;;  %v4460_v46 = vld [vmem:[%s213_s24] sm:$0xf]  ;;  %v3187_v49 = vor.u32 %v3609_v37, %v3186_v36  ;;  %v3573_v55 = vld [vmem:[%s4047_s8 + $0x534] sm:$0xf0]  ;;  %v3170_v56 = vld [vmem:[%s4047_s8 + $0x628] sm:$0xf] }
  0xea   : > { %2078 = vmatmul.bf16.vlgmr.msra.gmra.mxu3 %v4143_v6  ;;  %2084 = vmatpush.bf16.msrb.mxu0 %v2995_v52  ;;  %v3042_v52 = vld [vmem:[%s4047_s8 + $0x528] sm:$0xf]  ;;  %v3605_v57 = vld [vmem:[%s4047_s8 + $0x634] sm:$0xf0]  ;;  %v507_v61 = vperm.slane %v4460_v46, 0 }
  0xeb   : > { %v3298_v59 = vld [vmem:[%s4047_s8 + $0x728] sm:$0xf]  ;;  %v3637_v60 = vld [vmem:[%s4047_s8 + $0x734] sm:$0xf0]  ;;  %v2484_v36 = vld [vmem:[%s4047_s8 + $0xd8] sm:$0xf0] }
  0xec   : > { %2097 = vmatpush.bf16.msrb.mxu1 %v3123_v53  ;;  %2110 = vmatpush.bf16.msrb.mxu2 %v3251_v54  ;;  %v4465_v53 = vpop.f32.mrf.mxu2  ;;  %v3315_v54 = vor.u32 %v3641_v40, %v3314_v39  ;;  %v2898_v63 = vld [vmem:[%s4047_s8 + $0x408] sm:$0xf]  ;;  %v3569_v5 = vld [vmem:[%s4047_s8 + $0x514] sm:$0xf0]  ;;  %v3463_v37 = vld [vmem:[%s4047_s8 + $0x1cc] sm:$0xf]  ;;  %v2887_v39 = vor.u32 %v3531_v26, %v2884_v27 }
  0xed   : > { %2123 = vmatpush.bf16.msrb.mxu3 %v3379_v58  ;;  %v4470_v58 = vpop.f32.mrf.mxu3  ;;  %v3026_v3 = vld [vmem:[%s4047_s8 + $0x508] sm:$0xf]  ;;  %v3601_v9 = vld [vmem:[%s4047_s8 + $0x614] sm:$0xf0]  ;;  %v2612_v40 = vld [vmem:[%s4047_s8 + $0x1d8] sm:$0xf0] }
  0xee   : > { %2085 = vmatpush.bf16.msrb.mxu0 %v2979_v0  ;;  %v3537_v0 = vld [vmem:[%s4047_s8 + $0x414] sm:$0xf0]  ;;  %v3154_v7 = vld [vmem:[%s4047_s8 + $0x608] sm:$0xf]  ;;  %v3027_v24 = vor.u32 %v3569_v5, %v3026_v3  ;;  %v2615_v50 = vor.u32 %v3463_v37, %v2612_v40  ;;  %v3423_v3 = vld [vmem:[%s4047_s8 + $0x8c] sm:$0xf] }
  0xef   : > { %v3282_v10 = vld [vmem:[%s4047_s8 + $0x708] sm:$0xf]  ;;  %v3633_v11 = vld [vmem:[%s4047_s8 + $0x714] sm:$0xf0]  ;;  %v2899_v17 = vor.u32 %v3537_v0, %v2898_v63  ;;  %v3155_v25 = vor.u32 %v3601_v9, %v3154_v7  ;;  %v2452_v5 = vld [vmem:[%s4047_s8 + $0x98] sm:$0xf0] }
  0xf0   : > { %2098 = vmatpush.bf16.msrb.mxu1 %v3107_v1  ;;  %2111 = vmatpush.bf16.msrb.mxu2 %v3235_v2  ;;  %v1832_v43 = vpop.f32.mrf.mxu0  ;;  %v1845_v47 = vpop.f32.mrf.mxu1  ;;  %v3043_v1 = vor.u32 %v3573_v55, %v3042_v52  ;;  %v3171_v2 = vor.u32 %v3605_v57, %v3170_v56  ;;  %v2468_v55 = vld [vmem:[%s4047_s8 + $0xb8] sm:$0xf0]  ;;  %v3459_v56 = vld [vmem:[%s4047_s8 + $0x1ac] sm:$0xf] }
  0xf1   : > { %2124 = vmatpush.bf16.msrb.mxu3 %v3363_v8  ;;  %v3299_v8 = vor.u32 %v3637_v60, %v3298_v59  ;;  %v2596_v59 = vld [vmem:[%s4047_s8 + $0x1b8] sm:$0xf0]  ;;  %v3491_v60 = vld [vmem:[%s4047_s8 + $0x2ac] sm:$0xf] }
  0xf2   : > { %2086 = vmatpush.bf16.msrb.mxu0 %v2963_v14  ;;  %v3467_v14 = vld [vmem:[%s4047_s8 + $0x1ec] sm:$0xf]  ;;  %v2580_v9 = vld [vmem:[%s4047_s8 + $0x198] sm:$0xf0] }
  0xf3   : > { %v2631_v32 = vor.u32 %v3467_v14, %v2628_v18  ;;  %v3455_v7 = vld [vmem:[%s4047_s8 + $0x18c] sm:$0xf]  ;;  %v2436_v18 = vld [vmem:[%s4047_s8 + $0x78] sm:$0xf0] }
  0xf4   : > { %2099 = vmatpush.bf16.msrb.mxu1 %v3091_v15  ;;  %2112 = vmatpush.bf16.msrb.mxu2 %v3219_v16  ;;  %v1833_v15 = vadd.f32 %v1832_v43, %v507_v61  ;;  %v3495_v43 = vld [vmem:[%s4047_s8 + $0x2cc] sm:$0xf]  ;;  %v2724_v61 = vld [vmem:[%s4047_s8 + $0x2b8] sm:$0xf0] }
  0xf5   : > { %2125 = vmatpush.bf16.msrb.mxu3 %v3347_v22  ;;  %v2756_v22 = vld [vmem:[%s4047_s8 + $0x2f8] sm:$0xf0]  ;;  %v1873_v31 = vpop.f32.mrf.mxu3  ;;  %v3483_v26 = vld [vmem:[%s4047_s8 + $0x26c] sm:$0xf] }
  0xf6   : > { %2087 = vmatpush.bf16.msrb.mxu0 %v2947_v28  ;;  %v1860_v28 = vpop.f32.mrf.mxu2  ;;  %v2759_v33 = vor.u32 %v3499_v19, %v2756_v22  ;;  %v3451_v19 = vld [vmem:[%s4047_s8 + $0x16c] sm:$0xf]  ;;  %v2692_v27 = vld [vmem:[%s4047_s8 + $0x278] sm:$0xf0] }
  0xf7   : > { %v3515_v28 = vld [vmem:[%s4047_s8 + $0x36c] sm:$0xf]  ;;  %v2548_v40 = vld [vmem:[%s4047_s8 + $0x158] sm:$0xf0] }
  0xf8   : > { %2100 = vmatpush.bf16.msrb.mxu1 %v3075_v29  ;;  %2113 = vmatpush.bf16.msrb.mxu2 %v3203_v30  ;;  %v1834_v16 = vpop.f32.mrf.mxu0  ;;  %v1847_v23 = vpop.f32.mrf.mxu1  ;;  %v3283_v29 = vor.u32 %v3633_v11, %v3282_v10  ;;  %v2503_v30 = vor.u32 %v3435_v12, %v2500_v13  ;;  %v3487_v10 = vld [vmem:[%s4047_s8 + $0x28c] sm:$0xf]  ;;  %v2708_v11 = vld [vmem:[%s4047_s8 + $0x298] sm:$0xf0] }
  0xf9   : > { %2126 = vmatpush.bf16.msrb.mxu3 %v3331_v34  ;;  %v1846_v34 = vadd.f32 %v1845_v47, %v1833_v15  ;;  %v2487_v47 = vor.u32 %v3431_v35, %v2484_v36  ;;  %v3519_v12 = vld [vmem:[%s4047_s8 + $0x38c] sm:$0xf]  ;;  %v2836_v13 = vld [vmem:[%s4047_s8 + $0x398] sm:$0xf0]  ;;  %v2583_v15 = vor.u32 %v3455_v7, %v2580_v9  ;;  %v2711_v16 = vor.u32 %v3487_v10, %v2708_v11 }
  0xfa   : > { %2088 = vmatpush.bf16.msrb.mxu0 %v2931_v45  ;;  %v2740_v45 = vld [vmem:[%s4047_s8 + $0x2d8] sm:$0xf0]  ;;  %v3447_v36 = vld [vmem:[%s4047_s8 + $0x14c] sm:$0xf] }
  0xfb   : > { %v2743_v51 = vor.u32 %v3495_v43, %v2740_v45  ;;  %v1859_v52 = vadd.f32 %v4465_v53, %v1846_v34  ;;  %v2852_v53 = vld [vmem:[%s4047_s8 + $0x3b8] sm:$0xf0]  ;;  %v3415_v34 = vld [vmem:[%s4047_s8 + $0x4c] sm:$0xf] }
  0xfc   : > { %2101 = vmatpush.bf16.msrb.mxu1 %v3059_v48  ;;  %2114 = vmatpush.bf16.msrb.mxu2 %v3187_v49  ;;  %v3527_v48 = vld [vmem:[%s4047_s8 + $0x3cc] sm:$0xf]  ;;  %v2868_v49 = vld [vmem:[%s4047_s8 + $0x3d8] sm:$0xf0] }
  0xfd   : > { %2127 = vmatpush.bf16.msrb.mxu3 %v3315_v54  ;;  %v3427_v54 = vld [vmem:[%s4047_s8 + $0xac] sm:$0xf]  ;;  %v2871_v57 = vor.u32 %v3527_v48, %v2868_v49  ;;  %v1872_v0 = vadd.f32 %v4470_v58, %v1859_v52  ;;  %v2455_v58 = vor.u32 %v3423_v3, %v2452_v5  ;;  %v2420_v35 = vld [vmem:[%s4047_s8 + $0x58] sm:$0xf0] }
  0xfe   : > { %2089 = vmatpush.bf16.msrb.mxu0 %v2915_v62  ;;  %v3523_v62 = vld [vmem:[%s4047_s8 + $0x3ac] sm:$0xf]  ;;  %v2471_v63 = vor.u32 %v3427_v54, %v2468_v55  ;;  %v2676_v45 = vld [vmem:[%s4047_s8 + $0x258] sm:$0xf0]  ;;  %v2551_v55 = vor.u32 %v3447_v36, %v2548_v40 }
  0xff   : > { %v3479_v43 = vld [vmem:[%s4047_s8 + $0x24c] sm:$0xf]  ;;  %v2388_v7 = vld [vmem:[%s4047_s8 + $0x18] sm:$0xf0] }
 0x100   : > { %2102 = vmatpush.bf16.msrb.mxu1 %v3043_v1  ;;  %2115 = vmatpush.bf16.msrb.mxu2 %v3171_v2  ;;  %v2599_v1 = vor.u32 %v3459_v56, %v2596_v59  ;;  %v2727_v2 = vor.u32 %v3491_v60, %v2724_v61  ;;  %v2679_v56 = vor.u32 %v3479_v43, %v2676_v45  ;;  %v2404_v59 = vld [vmem:[%s4047_s8 + $0x38] sm:$0xf0]  ;;  %v3443_v60 = vld [vmem:[%s4047_s8 + $0x12c] sm:$0xf] }
 0x101   : > { %2128 = vmatpush.bf16.msrb.mxu3 %v3299_v8  ;;  %v2855_v8 = vor.u32 %v3523_v62, %v2852_v53  ;;  %v2532_v53 = vld [vmem:[%s4047_s8 + $0x138] sm:$0xf0]  ;;  %v3407_v5 = vld [vmem:[%s4047_s8 + $0xc] sm:$0xf] }
 0x102   : > { %2090 = vmatpush.bf16.msrb.mxu0 %v2899_v17  ;;  %v3419_v17 = vld [vmem:[%s4047_s8 + $0x6c] sm:$0xf]  ;;  %v2516_v11 = vld [vmem:[%s4047_s8 + $0x118] sm:$0xf0] }
 0x103   : > { %v2439_v31 = vor.u32 %v3419_v17, %v2436_v18  ;;  %v3439_v10 = vld [vmem:[%s4047_s8 + $0x10c] sm:$0xf]  ;;  %v2996_v36 = vld [vmem:[%s4047_s8 + $0x4d8] sm:$0xf0] }
 0x104   : > { %2103 = vmatpush.bf16.msrb.mxu1 %v3027_v24  ;;  %2116 = vmatpush.bf16.msrb.mxu2 %v3155_v25  ;;  %v1884_v14 = vpop.f32.mrf.mxu0  ;;  %v2839_v24 = vor.u32 %v3519_v12, %v2836_v13  ;;  %v2564_v25 = vld [vmem:[%s4047_s8 + $0x178] sm:$0xf0]  ;;  %v3471_v12 = vld [vmem:[%s4047_s8 + $0x20c] sm:$0xf] }
 0x105   : > { %2129 = vmatpush.bf16.msrb.mxu3 %v3283_v29  ;;  %2091 = vmatmul.bf16.vlgmr.msrb.gmra.mxu0 %v4211_v41  ;;  %v1885_v22 = vadd.f32 %v1884_v14, %v1872_v0  ;;  %v2820_v29 = vld [vmem:[%s4047_s8 + $0x378] sm:$0xf0]  ;;  %v3563_v18 = vld [vmem:[%s4047_s8 + $0x4ec] sm:$0xf] }
 0x106   : > { %2135 = vmatpush.bf16.msra.mxu0 %v2503_v30  ;;  %v1897_v23 = vpop.f32.mrf.mxu1  ;;  %v2660_v0 = vld [vmem:[%s4047_s8 + $0x238] sm:$0xf0]  ;;  %v3623_v43 = vld [vmem:[%s4047_s8 + $0x6cc] sm:$0xf] }
 0x107   : > { %2117 = vmatmul.bf16.vlgmr.msrb.gmra.mxu2 %v4207_v38  ;;  %2104 = vmatmul.bf16.vlgmr.msrb.gmra.mxu1 %v4215_v44  ;;  %v1898_v30 = vadd.f32 %v1897_v23, %v1885_v22  ;;  %v2644_v14 = vld [vmem:[%s4047_s8 + $0x218] sm:$0xf0]  ;;  %v3595_v22 = vld [vmem:[%s4047_s8 + $0x5ec] sm:$0xf]  ;;  %v2391_v23 = vor.u32 %v3407_v5, %v2388_v7 }
 0x108   : > { %2148 = vmatpush.bf16.msra.mxu1 %v2631_v32  ;;  %2161 = vmatpush.bf16.msra.mxu2 %v2759_v33  ;;  %v2567_v32 = vor.u32 %v3451_v19, %v2564_v25  ;;  %v2695_v33 = vor.u32 %v3483_v26, %v2692_v27  ;;  %v3012_v19 = vld [vmem:[%s4047_s8 + $0x4f8] sm:$0xf0]  ;;  %v3627_v25 = vld [vmem:[%s4047_s8 + $0x6ec] sm:$0xf]  ;;  %v2519_v27 = vor.u32 %v3439_v10, %v2516_v11 }
 0x109   : > { %2174 = vmatpush.bf16.msra.mxu3 %v2887_v39  ;;  %v2823_v39 = vor.u32 %v3515_v28, %v2820_v29  ;;  %v3268_v26 = vld [vmem:[%s4047_s8 + $0x6f8] sm:$0xf0]  ;;  %v2647_v28 = vor.u32 %v3471_v12, %v2644_v14  ;;  %v3659_v29 = vld [vmem:[%s4047_s8 + $0x7ec] sm:$0xf] }
 0x10a   : > { %2130 = vmatmul.bf16.vlgmr.msrb.gmra.mxu3 %v4213_v42  ;;  %2136 = vmatpush.bf16.msra.mxu0 %v2487_v47  ;;  %v1910_v37 = vpop.f32.mrf.mxu2  ;;  %v3511_v47 = vld [vmem:[%s4047_s8 + $0x34c] sm:$0xf]  ;;  %v3124_v40 = vld [vmem:[%s4047_s8 + $0x5d8] sm:$0xf0] }
 0x10b   : > { %v1911_v48 = vadd.f32 %v1910_v37, %v1898_v30  ;;  %v3396_v30 = vld [vmem:[%s4047_s8 + $0x7f8] sm:$0xf0]  ;;  %v3591_v37 = vld [vmem:[%s4047_s8 + $0x5cc] sm:$0xf] }
 0x10c   : > { %2149 = vmatpush.bf16.msra.mxu1 %v2615_v50  ;;  %2162 = vmatpush.bf16.msra.mxu2 %v2743_v51  ;;  %v2804_v50 = vld [vmem:[%s4047_s8 + $0x358] sm:$0xf0]  ;;  %v2423_v51 = vor.u32 %v3415_v34, %v2420_v35  ;;  %v1886_v54 = vpop.f32.mrf.mxu0  ;;  %v3271_v34 = vor.u32 %v3627_v25, %v3268_v26  ;;  %v3559_v35 = vld [vmem:[%s4047_s8 + $0x4cc] sm:$0xf] }
 0x10d   : > { %2175 = vmatpush.bf16.msra.mxu3 %v2871_v57  ;;  %v1923_v49 = vpop.f32.mrf.mxu3  ;;  %v3411_v57 = vld [vmem:[%s4047_s8 + $0x2c] sm:$0xf]  ;;  %v2807_v62 = vor.u32 %v3511_v47, %v2804_v50  ;;  %v3252_v45 = vld [vmem:[%s4047_s8 + $0x6d8] sm:$0xf0]  ;;  %v2999_v47 = vor.u32 %v3559_v35, %v2996_v36  ;;  %v3127_v50 = vor.u32 %v3591_v37, %v3124_v40 }
 0x10e   : > { %2137 = vmatpush.bf16.msra.mxu0 %v2471_v63  ;;  %v1924_v52 = vadd.f32 %v1923_v49, %v1911_v48  ;;  %v1899_v61 = vpop.f32.mrf.mxu1  ;;  %v3475_v63 = vld [vmem:[%s4047_s8 + $0x22c] sm:$0xf]  ;;  %v2407_v3 = vor.u32 %v3411_v57, %v2404_v59  ;;  %v3380_v49 = vld [vmem:[%s4047_s8 + $0x7d8] sm:$0xf0] }
 0x10f   : > { %v2663_v9 = vor.u32 %v3475_v63, %v2660_v0  ;;  %v3655_v48 = vld [vmem:[%s4047_s8 + $0x7cc] sm:$0xf]  ;;  %v2980_v54 = vld [vmem:[%s4047_s8 + $0x4b8] sm:$0xf0] }
 0x110   : > { %2150 = vmatpush.bf16.msra.mxu1 %v2599_v1  ;;  %2163 = vmatpush.bf16.msra.mxu2 %v2727_v2  ;;  %2239 = vst [vmem:[%s4543_s11] sm:$0xff] %v1924_v52  ;;  %v3507_v1 = vld [vmem:[%s4047_s8 + $0x32c] sm:$0xf]  ;;  %v2788_v2 = vld [vmem:[%s4047_s8 + $0x338] sm:$0xf0] }
 0x111   : > { %2176 = vmatpush.bf16.msra.mxu3 %v2855_v8  ;;  %v2535_v8 = vor.u32 %v3443_v60, %v2532_v53  ;;  %v3555_v52 = vld [vmem:[%s4047_s8 + $0x4ac] sm:$0xf]  ;;  %v3108_v57 = vld [vmem:[%s4047_s8 + $0x5b8] sm:$0xf0] }
 0x112   : > { %2138 = vmatpush.bf16.msra.mxu0 %v2455_v58  ;;  %v1912_v13 = vpop.f32.mrf.mxu2  ;;  %v2791_v58 = vor.u32 %v3507_v1, %v2788_v2  ;;  %v3619_v59 = vld [vmem:[%s4047_s8 + $0x6ac] sm:$0xf]  ;;  %v3236_v60 = vld [vmem:[%s4047_s8 + $0x6b8] sm:$0xf0]  ;;  %v2983_v53 = vor.u32 %v3555_v52, %v2980_v54 }
 0x113   : > { %v3651_v61 = vld [vmem:[%s4047_s8 + $0x7ac] sm:$0xf]  ;;  %v3239_v63 = vor.u32 %v3619_v59, %v3236_v60  ;;  %v2964_v1 = vld [vmem:[%s4047_s8 + $0x498] sm:$0xf0] }
 0x114   : > { %2151 = vmatpush.bf16.msra.mxu1 %v2583_v15  ;;  %2164 = vmatpush.bf16.msra.mxu2 %v2711_v16  ;;  %v3503_v15 = vld [vmem:[%s4047_s8 + $0x30c] sm:$0xf]  ;;  %v2772_v16 = vld [vmem:[%s4047_s8 + $0x318] sm:$0xf0] }
 0x115   : > { %2177 = vmatpush.bf16.msra.mxu3 %v2839_v24  ;;  %v1925_v17 = vpop.f32.mrf.mxu3  ;;  %v3140_v24 = vld [vmem:[%s4047_s8 + $0x5f8] sm:$0xf0]  ;;  %v3551_v0 = vld [vmem:[%s4047_s8 + $0x48c] sm:$0xf] }
 0x116   : > { %2139 = vmatpush.bf16.msra.mxu0 %v2439_v31  ;;  %v2775_v31 = vor.u32 %v3503_v15, %v2772_v16  ;;  %v3220_v5 = vld [vmem:[%s4047_s8 + $0x698] sm:$0xf0]  ;;  %v3647_v7 = vld [vmem:[%s4047_s8 + $0x78c] sm:$0xf] }
 0x117   : > { %v3547_v12 = vld [vmem:[%s4047_s8 + $0x46c] sm:$0xf]  ;;  %v2948_v13 = vld [vmem:[%s4047_s8 + $0x478] sm:$0xf0] }
 0x118   : > { %2152 = vmatpush.bf16.msra.mxu1 %v2567_v32  ;;  %2165 = vmatpush.bf16.msra.mxu2 %v2695_v33  ;;  %v3015_v32 = vor.u32 %v3563_v18, %v3012_v19  ;;  %v3143_v33 = vor.u32 %v3595_v22, %v3140_v24  ;;  %v3076_v16 = vld [vmem:[%s4047_s8 + $0x578] sm:$0xf0]  ;;  %v3611_v17 = vld [vmem:[%s4047_s8 + $0x66c] sm:$0xf] }
 0x119   : > { %2178 = vmatpush.bf16.msra.mxu3 %v2823_v39  ;;  %v3399_v39 = vor.u32 %v3659_v29, %v3396_v30  ;;  %v3204_v18 = vld [vmem:[%s4047_s8 + $0x678] sm:$0xf0]  ;;  %v3643_v19 = vld [vmem:[%s4047_s8 + $0x76c] sm:$0xf] }
 0x11a   : > { %2140 = vmatpush.bf16.msra.mxu0 %v2423_v51  ;;  %v3255_v51 = vor.u32 %v3623_v43, %v3252_v45  ;;  %v3332_v22 = vld [vmem:[%s4047_s8 + $0x778] sm:$0xf0]  ;;  %v3207_v25 = vor.u32 %v3611_v17, %v3204_v18  ;;  %v3543_v26 = vld [vmem:[%s4047_s8 + $0x44c] sm:$0xf] }
 0x11b   : > { %v3335_v30 = vor.u32 %v3643_v19, %v3332_v22  ;;  %v3639_v35 = vld [vmem:[%s4047_s8 + $0x74c] sm:$0xf]  ;;  %v3316_v36 = vld [vmem:[%s4047_s8 + $0x758] sm:$0xf0] }
 0x11c   : > { %2153 = vmatpush.bf16.msra.mxu1 %v2551_v55  ;;  %2166 = vmatpush.bf16.msra.mxu2 %v2679_v56  ;;  %v3587_v55 = vld [vmem:[%s4047_s8 + $0x5ac] sm:$0xf]  ;;  %v3383_v56 = vor.u32 %v3655_v48, %v3380_v49  ;;  %v2916_v48 = vld [vmem:[%s4047_s8 + $0x438] sm:$0xf0] }
 0x11d   : > { %2179 = vmatpush.bf16.msra.mxu3 %v2807_v62  ;;  %v3364_v62 = vld [vmem:[%s4047_s8 + $0x7b8] sm:$0xf0]  ;;  %v3539_v45 = vld [vmem:[%s4047_s8 + $0x42c] sm:$0xf] }
 0x11e   : > { %2141 = vmatpush.bf16.msra.mxu0 %v2407_v3  ;;  %v3367_v2 = vor.u32 %v3651_v61, %v3364_v62  ;;  %v3092_v3 = vld [vmem:[%s4047_s8 + $0x598] sm:$0xf0]  ;;  %v3571_v49 = vld [vmem:[%s4047_s8 + $0x52c] sm:$0xf]  ;;  %v2919_v59 = vor.u32 %v3539_v45, %v2916_v48 }
 0x11f   : > { %v3603_v52 = vld [vmem:[%s4047_s8 + $0x62c] sm:$0xf]  ;;  %v3172_v54 = vld [vmem:[%s4047_s8 + $0x638] sm:$0xf0] }
 0x120   : > { %2154 = vmatpush.bf16.msra.mxu1 %v2535_v8  ;;  %2167 = vmatpush.bf16.msra.mxu2 %v2663_v9  ;;  %v3348_v8 = vld [vmem:[%s4047_s8 + $0x798] sm:$0xf0]  ;;  %v3175_v61 = vor.u32 %v3603_v52, %v3172_v54  ;;  %v3535_v62 = vld [vmem:[%s4047_s8 + $0x40c] sm:$0xf] }
 0x121   : > { %2180 = vmatpush.bf16.msra.mxu3 %v2791_v58  ;;  %v3579_v58 = vld [vmem:[%s4047_s8 + $0x56c] sm:$0xf]  ;;  %v3351_v15 = vor.u32 %v3647_v7, %v3348_v8 }
 0x122   : > { %2142 = vmatpush.bf16.msra.mxu0 %v2391_v23  ;;  %v4595_v9 = vpop.f32.mrf.mxu0  ;;  %v2951_v23 = vor.u32 %v3547_v12, %v2948_v13  ;;  %v3079_v24 = vor.u32 %v3579_v58, %v3076_v16 }
 0x124   : > { %2155 = vmatpush.bf16.msra.mxu1 %v2519_v27  ;;  %2168 = vmatpush.bf16.msra.mxu2 %v2647_v28  ;;  %v4600_v14 = vpop.f32.mrf.mxu1  ;;  %v2932_v27 = vld [vmem:[%s4047_s8 + $0x458] sm:$0xf0]  ;;  %v3575_v28 = vld [vmem:[%s4047_s8 + $0x54c] sm:$0xf] }
 0x125   : > { %2181 = vmatpush.bf16.msra.mxu3 %v2775_v31  ;;  %2143 = vmatmul.bf16.vlgmr.msra.gmra.mxu0 %v4154_v20  ;;  %v3615_v20 = vld [vmem:[%s4047_s8 + $0x68c] sm:$0xf]  ;;  %v3060_v31 = vld [vmem:[%s4047_s8 + $0x558] sm:$0xf0]  ;;  %v2935_v37 = vor.u32 %v3543_v26, %v2932_v27 }
 0x126   : > { %2187 = vmatpush.bf16.msrb.mxu0 %v3015_v32  ;;  %v3223_v11 = vor.u32 %v3615_v20, %v3220_v5  ;;  %v3607_v32 = vld [vmem:[%s4047_s8 + $0x64c] sm:$0xf]  ;;  %v3063_v40 = vor.u32 %v3575_v28, %v3060_v31  ;;  %v3284_v5 = vld [vmem:[%s4047_s8 + $0x718] sm:$0xf0] }
 0x127   : > { %2169 = vmatmul.bf16.vlgmr.msra.gmra.mxu2 %v4141_v4  ;;  %2156 = vmatmul.bf16.vlgmr.msra.gmra.mxu1 %v4157_v21  ;;  %v3111_v4 = vor.u32 %v3587_v55, %v3108_v57  ;;  %v2967_v21 = vor.u32 %v3551_v0, %v2964_v1  ;;  %v3635_v55 = vld [vmem:[%s4047_s8 + $0x72c] sm:$0xf]  ;;  %v508_v57 = vperm.slane %v4460_v46, 1  ;;  %v3028_v1 = vld [vmem:[%s4047_s8 + $0x518] sm:$0xf0] }
 0x128   : > { %2200 = vmatpush.bf16.msrb.mxu1 %v3143_v33  ;;  %2213 = vmatpush.bf16.msrb.mxu2 %v3271_v34  ;;  %v3188_v33 = vld [vmem:[%s4047_s8 + $0x658] sm:$0xf0]  ;;  %v3631_v20 = vld [vmem:[%s4047_s8 + $0x70c] sm:$0xf] }
 0x129   : > { %2226 = vmatpush.bf16.msrb.mxu3 %v3399_v39  ;;  %v3191_v43 = vor.u32 %v3607_v32, %v3188_v33  ;;  %v1937_v7 = vadd.f32 %v4595_v9, %v508_v57 }
 0x12a   : > { %2182 = vmatmul.bf16.vlgmr.msra.gmra.mxu3 %v4143_v6  ;;  %2188 = vmatpush.bf16.msrb.mxu0 %v2999_v47  ;;  %v3583_v6 = vld [vmem:[%s4047_s8 + $0x58c] sm:$0xf]  ;;  %v1962_v29 = vpop.f32.mrf.mxu2  ;;  %v1938_v39 = vpop.f32.mrf.mxu0 }
 0x12b   : > { %v3095_v10 = vor.u32 %v3583_v6, %v3092_v3  ;;  %v3599_v6 = vld [vmem:[%s4047_s8 + $0x60c] sm:$0xf]  ;;  %v1950_v12 = vadd.f32 %v4600_v14, %v1937_v7 }
 0x12c   : > { %2201 = vmatpush.bf16.msrb.mxu1 %v3127_v50  ;;  %2214 = vmatpush.bf16.msrb.mxu2 %v3255_v51  ;;  %v1951_v47 = vpop.f32.mrf.mxu1  ;;  %v3319_v50 = vor.u32 %v3639_v35, %v3316_v36  ;;  %v3044_v51 = vld [vmem:[%s4047_s8 + $0x538] sm:$0xf0] }
 0x12d   : > { %2227 = vmatpush.bf16.msrb.mxu3 %v3383_v56  ;;  %v1975_v34 = vpop.f32.mrf.mxu3  ;;  %v3300_v56 = vld [vmem:[%s4047_s8 + $0x738] sm:$0xf0]  ;;  %v3047_v60 = vor.u32 %v3571_v49, %v3044_v51  ;;  %v1963_v13 = vadd.f32 %v1962_v29, %v1950_v12  ;;  %v509_v29 = vperm.slane %v4460_v46, 2 }
 0x12e   : > { %2189 = vmatpush.bf16.msrb.mxu0 %v2983_v53  ;;  %v2900_v53 = vld [vmem:[%s4047_s8 + $0x418] sm:$0xf0]  ;;  %v3303_v0 = vor.u32 %v3635_v55, %v3300_v56 }
 0x12f   : > { %v2903_v8 = vor.u32 %v3535_v62, %v2900_v53  ;;  %v1976_v9 = vadd.f32 %v1975_v34, %v1963_v13 }
 0x130   : > { %2202 = vmatpush.bf16.msrb.mxu1 %v3111_v4  ;;  %2215 = vmatpush.bf16.msrb.mxu2 %v3239_v63  ;;  %v3567_v4 = vld [vmem:[%s4047_s8 + $0x50c] sm:$0xf] }
 0x131   : > { %2228 = vmatpush.bf16.msrb.mxu3 %v3367_v2  ;;  %v3156_v2 = vld [vmem:[%s4047_s8 + $0x618] sm:$0xf0] }
 0x132   : > { %2190 = vmatpush.bf16.msrb.mxu0 %v2967_v21  ;;  %v1964_v63 = vpop.f32.mrf.mxu2  ;;  %v3031_v21 = vor.u32 %v3567_v4, %v3028_v1 }
 0x134   : > { %2203 = vmatpush.bf16.msrb.mxu1 %v3095_v10  ;;  %2216 = vmatpush.bf16.msrb.mxu2 %v3223_v11  ;;  %v3159_v10 = vor.u32 %v3599_v6, %v3156_v2  ;;  %v3287_v11 = vor.u32 %v3631_v20, %v3284_v5 }
 0x135   : > { %2229 = vmatpush.bf16.msrb.mxu3 %v3351_v15  ;;  %v1977_v3 = vpop.f32.mrf.mxu3 }
 0x136   : > { %2191 = vmatpush.bf16.msrb.mxu0 %v2951_v23 }
 0x138   : > { %2204 = vmatpush.bf16.msrb.mxu1 %v3079_v24  ;;  %2217 = vmatpush.bf16.msrb.mxu2 %v3207_v25 }
 0x139   : > { %2230 = vmatpush.bf16.msrb.mxu3 %v3335_v30 }
 0x13a   : > { %2192 = vmatpush.bf16.msrb.mxu0 %v2935_v37 }
 0x13c   : > { %2205 = vmatpush.bf16.msrb.mxu1 %v3063_v40  ;;  %2218 = vmatpush.bf16.msrb.mxu2 %v3191_v43 }
 0x13d   : > { %2231 = vmatpush.bf16.msrb.mxu3 %v3319_v50 }
 0x13e   : > { %2193 = vmatpush.bf16.msrb.mxu0 %v2919_v59 }
 0x140   : > { %2206 = vmatpush.bf16.msrb.mxu1 %v3047_v60  ;;  %2219 = vmatpush.bf16.msrb.mxu2 %v3175_v61  ;;  %v510_v61 = vperm.slane %v4460_v46, 3 }
 0x141   : > { %2232 = vmatpush.bf16.msrb.mxu3 %v3303_v0 }
 0x142   : > { %2194 = vmatpush.bf16.msrb.mxu0 %v2903_v8  ;;  %v1988_v58 = vpop.f32.mrf.mxu0 }
 0x143   : > { %v1989_v15 = vadd.f32 %v1988_v58, %v1976_v9 }
 0x144   : > { %2207 = vmatpush.bf16.msrb.mxu1 %v3031_v21  ;;  %2220 = vmatpush.bf16.msrb.mxu2 %v3159_v10  ;;  %v2001_v16 = vpop.f32.mrf.mxu1 }
 0x145   : > { %2233 = vmatpush.bf16.msrb.mxu3 %v3287_v11  ;;  %2195 = vmatmul.bf16.vlgmr.msrb.gmra.mxu0 %v4211_v41  ;;  %v2002_v17 = vadd.f32 %v2001_v16, %v1989_v15 }
 0x147   : > { %2208 = vmatmul.bf16.vlgmr.msrb.gmra.mxu1 %v4215_v44  ;;  %2221 = vmatmul.bf16.vlgmr.msrb.gmra.mxu2 %v4207_v38 }
 0x148   : > { %2234 = vmatmul.bf16.vlgmr.msrb.gmra.mxu3 %v4213_v42 }
 0x14a   : > { %v2014_v14 = vpop.f32.mrf.mxu2  ;;  %v1990_v23 = vpop.f32.mrf.mxu0 }
 0x14b   : > { %v2015_v18 = vadd.f32 %v2014_v14, %v2002_v17 }
 0x14c   : > { %v2003_v24 = vpop.f32.mrf.mxu1 }
 0x14d   : > { %v2027_v19 = vpop.f32.mrf.mxu3 }
 0x14e   : > { %v2028_v22 = vadd.f32 %v2027_v19, %v2015_v18 }
 0x150   : > { %2240 = vst [vmem:[%s4543_s11 + $0x8] sm:$0xff] %v2028_v22 }
 0x152   : > { %v2016_v41 = vpop.f32.mrf.mxu2 }
 0x155   : > { %v2029_v25 = vpop.f32.mrf.mxu3 }
 0x162   : > { %v2040_v26 = vpop.f32.mrf.mxu0 }
 0x163   : > { %v2041_v32 = vadd.f32 %v2040_v26, %v509_v29 }
 0x164   : > { %v2053_v44 = vpop.f32.mrf.mxu1 }
 0x165   : > { %v2054_v33 = vadd.f32 %v2053_v44, %v2041_v32 }
 0x16a   : > { %v2066_v27 = vpop.f32.mrf.mxu2  ;;  %v2042_v28 = vpop.f32.mrf.mxu0 }
 0x16b   : > { %v2067_v34 = vadd.f32 %v2066_v27, %v2054_v33 }
 0x16c   : > { %v2055_v42 = vpop.f32.mrf.mxu1 }
 0x16d   : > { %v2079_v38 = vpop.f32.mrf.mxu3 }
 0x16e   : > { %v2080_v35 = vadd.f32 %v2079_v38, %v2067_v34 }
 0x172   : > { %v2068_v30 = vpop.f32.mrf.mxu2 }
 0x175   : > { %v2081_v31 = vpop.f32.mrf.mxu3 }
 0x182   : > { %v2092_v36 = vpop.f32.mrf.mxu0 }
 0x183   : > { %v2093_v37 = vadd.f32 %v2092_v36, %v2080_v35 }
 0x184   : > { %v2105_v39 = vpop.f32.mrf.mxu1 }
 0x185   : > { %v2106_v40 = vadd.f32 %v2105_v39, %v2093_v37 }
 0x18a   : > { %v2118_v43 = vpop.f32.mrf.mxu2  ;;  %v2094_v47 = vpop.f32.mrf.mxu0 }
 0x18b   : > { %v2119_v45 = vadd.f32 %v2118_v43, %v2106_v40 }
 0x18c   : > { %v2107_v50 = vpop.f32.mrf.mxu1 }
 0x18d   : > { %v2131_v48 = vpop.f32.mrf.mxu3 }
 0x18e   : > { %v2132_v49 = vadd.f32 %v2131_v48, %v2119_v45 }
 0x190   : > { %2241 = vst [vmem:[%s4543_s11 + $0x10] sm:$0xff] %v2132_v49 }
 0x192   : > { %v2120_v51 = vpop.f32.mrf.mxu2 }
 0x195   : > { %v2133_v52 = vpop.f32.mrf.mxu3 }
 0x1a2   : > { %v2144_v54 = vpop.f32.mrf.mxu0 }
 0x1a3   : > { %v2145_v4 = vadd.f32 %v2144_v54, %v510_v61 }
 0x1a4   : > { %v2157_v55 = vpop.f32.mrf.mxu1 }
 0x1a5   : > { %v2158_v63 = vadd.f32 %v2157_v55, %v2145_v4 }
 0x1aa   : > { %v2170_v56 = vpop.f32.mrf.mxu2  ;;  %v2146_v59 = vpop.f32.mrf.mxu0 }
 0x1ab   : > { %v2171_v0 = vadd.f32 %v2170_v56, %v2158_v63 }
 0x1ac   : > { %v2159_v60 = vpop.f32.mrf.mxu1 }
 0x1ad   : > { %v2183_v57 = vpop.f32.mrf.mxu3 }
 0x1ae   : > { %v2184_v1 = vadd.f32 %v2183_v57, %v2171_v0 }
 0x1b2   : > { %v2172_v62 = vpop.f32.mrf.mxu2 }
 0x1b5   : > { %v2185_v53 = vpop.f32.mrf.mxu3 }
 0x1c2   : > { %v2196_v6 = vpop.f32.mrf.mxu0 }
 0x1c3   : > { %v2197_v3 = vadd.f32 %v2196_v6, %v2184_v1 }
 0x1c4   : > { %v2209_v2 = vpop.f32.mrf.mxu1 }
 0x1c5   : > { %v2210_v20 = vadd.f32 %v2209_v2, %v2197_v3 }
 0x1ca   : > { %v2222_v5 = vpop.f32.mrf.mxu2  ;;  %v2198_v8 = vpop.f32.mrf.mxu0 }
 0x1cb   : > { %v2223_v46 = vadd.f32 %v2222_v5, %v2210_v20  ;;  %v2235_v7 = vpop.f32.mrf.mxu3 }
 0x1cc   : > { %v2211_v21 = vpop.f32.mrf.mxu1 }
 0x1cd   : > { %v2236_v10 = vadd.f32 %v2235_v7, %v2223_v46 }
 0x1cf   : > { %2242 = vst [vmem:[%s4543_s11 + $0x18] sm:$0xff] %v2236_v10 }
 0x1d0   : > { %3845 = shalt.err (!%p3842_p3)
}
 0x1d1   : > { %3671 = dma.vmem_to_hbm [thread:$0]  (%p3998_p9), %s2258_s21, 512, %s2260_s27, %s2244_s28  }
 0x1d2   : > { %v2224_v11 = vpop.f32.mrf.mxu2 }
 0x1d3   : > { %v2237_v12 = vpop.f32.mrf.mxu3 }
 0x1d4 PF: > { %p3691_p4 = scmp.ge.s32.totalorder %s3888_s15, 2  ;;  %s2271_s29 = sand.u32 1, %s3876_s12  }
 0x1d5   : > { %s2272_s8 = scalar_lea.sflag [#allocation4], %s2271_s29 }
 0x1d6   : > { %p3685_p6 = pnand %p3691_p4, %p4002_p10 }
 0x1d8   : > { %p3686_p11 = pneg %p3685_p6 }
 0x1da   : > { %3871 = dma.done.wait (%p3686_p11), %s2272_s8, 512  }
 0x1db   : > { %3873 = vsyncadd (%p3686_p11), %s2272_s8, 4294966784  ;;  %p17_p9 = scmp.ge.s32.totalorder %s3935_s16, 6   ;;  %s4687_s12 = smov %s3880_s13 }
 0x1dc   : > { %s4688_s13 = smov %s3884_s14  ;;  %s4689_s14 = smov %s3945_s19 }
 0x1dd   : > { %s4690_s15 = smov %s3935_s16  ;;  %19 = sbr.rel (!%p17_p9) target bundleno = 8 (0x8), region = 93 }
 0x1e2   :  { %2278 = vsyncpa [#allocation3], 1 }
 0x1e3   :  { %2280 = vsyncpa [#allocation3 + $0x1], 1 }
 0x1e4   :  { %2281 = vsyncpa [#allocation6], 1 }
 0x1e5   :  { %2283 = vsyncpa [#allocation6 + $0x1], 1 }
 0x1e6   :  { %2284 = vsyncpa [#allocation4], 1 }
 0x1e7   :  { %2286 = vsyncpa [#allocation4 + $0x1], 1 }

</bundles_post_ra>
